<compile_context>
chip_gen: v6e
topology: v6e:2x2x1
jax: 0.10.0
libtpu: 0.0.40
codegen_flags: <defaults>
</compile_context>

<pallas_src>
import functools

import jax
import jax.numpy as jnp
from jax.experimental import pallas as pl
from jax.experimental.pallas import tpu as pltpu


def dot_model_kernel(u_ref, i_ref, w_ref, b_ref, o_ref, *, scale):
    """One (block_b, H) tile of the DotModel forward (eval mode)."""
    u = u_ref[...].astype(jnp.float32)          # (TB, H)
    i = i_ref[...].astype(jnp.float32)          # (TB, H)
    w = w_ref[...].astype(jnp.float32)          # (1, H), broadcast over rows
    # TODO(synk): F.dropout with training=False is identity; no dropout applied.
    # Linear(H, 1) fused into the elementwise pass: VPU multiply + XLU reduce.
    logits = jnp.sum(u * i * w, axis=-1, keepdims=True) + b_ref[0, 0]   # (TB, 1)
    out = jax.nn.sigmoid(logits)
    if scale is not None:
        out = out * jnp.float32(scale)
    # Lane-dense store: (TB, 1) -> (1, 1, TB) slab.
    o_ref[...] = out.reshape(1, 1, -1).astype(o_ref.dtype)


def _default_block_b(batch):
    # Largest lane/sublane-friendly divisor of the batch; fall back to the full
    # batch (block == full array is always a legal BlockSpec).
    for cand in (4096, 2048, 1024, 512, 256, 128):
        if batch % cand == 0:
            return cand
    return batch


def dot_model_forward(users, items, u_emb, i_emb, w, b, *,
                      scale=None, block_b=None, input_dtype=jnp.bfloat16):
    """Forward pass equivalent to DotModel.forward (eval mode)."""
    # Embedding lookups (glue: gather in plain JAX).
    # TODO(synk): for large H the gather could be fused into the kernel via
    # scalar-prefetched indices + pl.Element row gathers; at H=32 each row is
    # only 128 B per DMA, so the XLA gather + blocked re-read is kept here.
    user_vecs = jnp.take(u_emb, users, axis=0).astype(input_dtype)   # (B, H)
    item_vecs = jnp.take(i_emb, items, axis=0).astype(input_dtype)   # (B, H)
    B, H = user_vecs.shape

    if block_b is None:
        block_b = _default_block_b(B)
    assert B % block_b == 0, (B, block_b)
    num_blocks = B // block_b

    w = jnp.asarray(w, jnp.float32).reshape(1, H)
    b = jnp.asarray(b, jnp.float32).reshape(1, 1)

    kernel = functools.partial(dot_model_kernel, scale=scale)
    out = pl.pallas_call(
        kernel,
        out_shape=jax.ShapeDtypeStruct((num_blocks, 1, block_b), jnp.float32),
        grid_spec=pltpu.PrefetchScalarGridSpec(
            num_scalar_prefetch=0,
            grid=(num_blocks,),
            in_specs=[
                pl.BlockSpec((block_b, H), lambda g: (g, 0)),        # user vecs
                pl.BlockSpec((block_b, H), lambda g: (g, 0)),        # item vecs
                pl.BlockSpec((1, H), lambda g: (0, 0)),              # fc weight
                pl.BlockSpec(memory_space=pltpu.MemorySpace.SMEM),   # fc bias
            ],
            out_specs=pl.BlockSpec((1, 1, block_b), lambda g: (g, 0, 0)),
        ),
        compiler_params=pltpu.CompilerParams(
            dimension_semantics=("parallel",),
            vmem_limit_bytes=32 * 1024 * 1024,
        ),
    )(user_vecs, item_vecs, w, b)
    return out.reshape(B, 1)


def dot_model_reference(users, items, u_emb, i_emb, w, b, scale=None):
    uv = jnp.take(u_emb, users, axis=0)
    iv = jnp.take(i_emb, items, axis=0)
    logits = (uv * iv) @ w.reshape(1, -1).T + b.reshape(1, 1)
    out = jax.nn.sigmoid(logits)
    if scale is not None:
        out = out * scale
    return out


if __name__ == "__main__":
    # Module hyper-parameters (small, deterministic).
    n_users, n_items, hidden_dims = 100, 200, 32
    scale = None          # DotModel default
    batch = 256           # -> block_b = 128, grid = (2,)

    key = jax.random.PRNGKey(0)
    k_ue, k_ie, k_w, k_b, k_u, k_i = jax.random.split(key, 6)

    # Deterministic parameter init (shapes per nn.Embedding / nn.Linear).
    u_emb = jax.random.normal(k_ue, (n_users, hidden_dims), jnp.float32)
    i_emb = jax.random.normal(k_ie, (n_items, hidden_dims), jnp.float32)
    w = jax.random.normal(k_w, (1, hidden_dims), jnp.float32) * 0.1   # Linear.weight (1, H)
    b = jax.random.normal(k_b, (1, 1), jnp.float32) * 0.1             # Linear.bias

    # Example inputs: integer user / item indices.
    users = jax.random.randint(k_u, (batch,), 0, n_users, jnp.int32)
    items = jax.random.randint(k_i, (batch,), 0, n_items, jnp.int32)

    ref = dot_model_reference(users, items, u_emb, i_emb, w, b, scale=scale)

    # f32-input run: tight check of the kernel math.
    out_f32 = dot_model_forward(users, items, u_emb, i_emb, w, b,
                                scale=scale, input_dtype=jnp.float32)
    out_f32 = jax.block_until_ready(out_f32)
    assert out_f32.shape == (batch, 1)
    assert jnp.allclose(out_f32, ref, atol=1e-5, rtol=1e-5)

    # Default bf16-input run (halved HBM traffic): loose tolerance vs f32 ref.
    out_bf16 = dot_model_forward(users, items, u_emb, i_emb, w, b, scale=scale)
    out_bf16 = jax.block_until_ready(out_bf16)
    assert out_bf16.shape == (batch, 1)
    assert jnp.allclose(out_bf16, ref, atol=2e-2, rtol=1e-2)

    print("KERNEL_OK")
</pallas_src>

<mosaic_0001>
module attributes {stable_mosaic.version = 11 : i64} {
  func.func @dot_model_kernel(%arg0: i32, %arg1: memref<256x32xf32, #tpu.memory_space<vmem>>, %arg2: memref<256x32xf32, #tpu.memory_space<vmem>>, %arg3: memref<1x32xf32, #tpu.memory_space<vmem>>, %arg4: memref<1x1xf32, #tpu.memory_space<smem>>, %arg5: memref<1x1x256xf32, #tpu.memory_space<vmem>>) attributes {dimension_semantics = [#tpu.dimension_semantics<parallel>], iteration_bounds = array<i64: 1>, scalar_prefetch = 0 : i64, scratch_operands = 0 : i64, tpu.core_type = #tpu.core_type<tc>, window_params = [{transform_indices = @transform_0, window_bounds = array<i64: 256, 32>}, {transform_indices = @transform_1, window_bounds = array<i64: 256, 32>}, {pipeline_mode = #tpu.pipeline_mode<synchronous>, transform_indices = @transform_2, window_bounds = array<i64: 1, 32>}, {transform_indices = @transform_3, window_bounds = array<i64: 1, 1>}, {transform_indices = @transform_4, window_bounds = array<i64: 1, 1, 256>}]} {
    %c0 = arith.constant 0 : index
    %c0_0 = arith.constant 0 : index
    %0 = vector.load %arg1[%c0, %c0_0] : memref<256x32xf32, #tpu.memory_space<vmem>>, vector<256x32xf32>
    %c0_1 = arith.constant 0 : index
    %c0_2 = arith.constant 0 : index
    %1 = vector.load %arg2[%c0_1, %c0_2] : memref<256x32xf32, #tpu.memory_space<vmem>>, vector<256x32xf32>
    %c0_3 = arith.constant 0 : index
    %c0_4 = arith.constant 0 : index
    %2 = vector.load %arg3[%c0_3, %c0_4] : memref<1x32xf32, #tpu.memory_space<vmem>>, vector<1x32xf32>
    %3 = arith.mulf %0, %1 : vector<256x32xf32>
    %4 = vector.broadcast %2 : vector<1x32xf32> to vector<256x32xf32>
    %5 = arith.mulf %3, %4 : vector<256x32xf32>
    %cst = arith.constant dense<0.000000e+00> : vector<256xf32>
    %6 = vector.multi_reduction <add>, %5, %cst [1] : vector<256x32xf32> to vector<256xf32>
    %7 = vector.shape_cast %6 : vector<256xf32> to vector<256x1xf32>
    %c0_5 = arith.constant 0 : index
    %c0_6 = arith.constant 0 : index
    %8 = memref.load %arg4[%c0_5, %c0_6] : memref<1x1xf32, #tpu.memory_space<smem>>
    %9 = vector.broadcast %8 : f32 to vector<256x1xf32>
    %10 = arith.addf %7, %9 : vector<256x1xf32>
    %11 = arith.negf %10 : vector<256x1xf32>
    %12 = math.exp %11 : vector<256x1xf32>
    %cst_7 = arith.constant 1.000000e+00 : f32
    %13 = vector.broadcast %cst_7 : f32 to vector<256x1xf32>
    %14 = arith.addf %13, %12 : vector<256x1xf32>
    %15 = arith.divf %13, %14 : vector<256x1xf32>
    %16 = vector.shape_cast %15 : vector<256x1xf32> to vector<1x1x256xf32>
    %c0_8 = arith.constant 0 : index
    %c0_9 = arith.constant 0 : index
    %c0_10 = arith.constant 0 : index
    %17 = vector.load %arg5[%c0_8, %c0_9, %c0_10] : memref<1x1x256xf32, #tpu.memory_space<vmem>>, vector<1x1x256xf32>
    tpu.vector_store %arg5[%c0_8, %c0_9, %c0_10], %16 {strides = array<i32>} : memref<1x1x256xf32, #tpu.memory_space<vmem>>, vector<1x1x256xf32>,
    return
  }
  func.func @transform_0(%arg0: i32) -> (i32, i32) {
    %c0_i32 = arith.constant 0 : i32
    %c0_i32_0 = arith.constant 0 : i32
    return %arg0, %c0_i32 : i32, i32
  }
  func.func @transform_1(%arg0: i32) -> (i32, i32) {
    %c0_i32 = arith.constant 0 : i32
    %c0_i32_0 = arith.constant 0 : i32
    return %arg0, %c0_i32 : i32, i32
  }
  func.func @transform_2(%arg0: i32) -> (i32, i32) {
    %c0_i32 = arith.constant 0 : i32
    %c0_i32_0 = arith.constant 0 : i32
    %c0_i32_1 = arith.constant 0 : i32
    return %c0_i32, %c0_i32_0 : i32, i32
  }
  func.func @transform_3(%arg0: i32) -> (i32, i32) {
    %c0_i32 = arith.constant 0 : i32
    %c0_i32_0 = arith.constant 0 : i32
    %c0_i32_1 = arith.constant 0 : i32
    return %c0_i32, %c0_i32_0 : i32, i32
  }
  func.func @transform_4(%arg0: i32) -> (i32, i32, i32) {
    %c0_i32 = arith.constant 0 : i32
    %c0_i32_0 = arith.constant 0 : i32
    %c0_i32_1 = arith.constant 0 : i32
    return %arg0, %c0_i32, %c0_i32_0 : i32, i32, i32
  }
}

</mosaic_0001>

<bundles_post_ra>
// kernel: tpu_custom_call.1
= control target key start
LH: loop header
LB: loop body
LE: loop exit
PB: predicated region body
PF: predicated region fallthrough
CT: control target
= control target key end

     0   :  { %vm154_vm0 = vcmask 261120   ;;  %s4840_s0 = inlined_call_operand.vmem [shape: f32[256,32], index: 0, kind: input, shape index: {}]   ;;  %s4841_s1 = inlined_call_operand.vmem [shape: f32[256,32], index: 1, kind: input, shape index: {}]   ;;  %s4842_s2 = inlined_call_operand.vmem [shape: f32[1,32], index: 2, kind: input, shape index: {}]   ;;  %s4843_s3 = inlined_call_operand.<no memory space> [shape: f32[1,1], index: 3, kind: input, shape index: {}]   ;;  %s4844_s4 = inlined_call_operand.hbm [shape: f32[1,1,256], index: 4, kind: output, shape index: {}]  }
   0x1   :  { %v19_v0 = vld [vmem:[%s4840_s0] sm:$0xff]  ;;  %v20_v4 = vld [vmem:[%s4840_s0 + $0x8] sm:$0xff]  ;;  %v21_v6 = vld [vmem:[%s4840_s0 + $0x10] sm:$0xff] }
   0x2   :  { %v51_v1 = vld [vmem:[%s4841_s1] sm:$0xff]  ;;  %v52_v5 = vld [vmem:[%s4841_s1 + $0x8] sm:$0xff]  ;;  %v53_v8 = vld [vmem:[%s4841_s1 + $0x10] sm:$0xff] }
   0x3   :  { %v3647_v2 = vld [vmem:[%s4842_s2] ss:$0 sm:$0xff]  ;;  %v84_v3 = vmul.f32 %v51_v1, %v19_v0  ;;  %v85_v7 = vmul.f32 %v52_v5, %v20_v4  ;;  %v86_v12 = vmul.f32 %v53_v8, %v21_v6  ;;  %v22_v14 = vld [vmem:[%s4840_s0 + $0x18] sm:$0xff]  ;;  %v37_v18 = vld [vmem:[%s4840_s0 + $0x90] sm:$0xff] }
   0x4   :  { %v35_v9 = vld [vmem:[%s4840_s0 + $0x80] sm:$0xff]  ;;  %v54_v15 = vld [vmem:[%s4841_s1 + $0x18] sm:$0xff]  ;;  %v69_v19 = vld [vmem:[%s4841_s1 + $0x90] sm:$0xff] }
   0x5   :  { %v67_v10 = vld [vmem:[%s4841_s1 + $0x80] sm:$0xff]  ;;  %v122_v11 = vmul.f32 %v3647_v2, %v84_v3  ;;  %v123_v16 = vmul.f32 %v3647_v2, %v85_v7  ;;  %v87_v17 = vmul.f32 %v54_v15, %v22_v14  ;;  %v124_v21 = vmul.f32 %v3647_v2, %v86_v12  ;;  %v36_v23 = vld [vmem:[%s4840_s0 + $0x88] sm:$0xff]  ;;  %v38_v29 = vld [vmem:[%s4840_s0 + $0x98] sm:$0xff] }
   0x6   :  { %v100_v13 = vmul.f32 %v67_v10, %v35_v9  ;;  %v68_v24 = vld [vmem:[%s4841_s1 + $0x88] sm:$0xff]  ;;  %v102_v28 = vmul.f32 %v69_v19, %v37_v18  ;;  %v23_v30 = vld [vmem:[%s4840_s0 + $0x20] sm:$0xff]  ;;  %v70_v33 = vld [vmem:[%s4841_s1 + $0x98] sm:$0xff] }
   0x7   :  { %v155_v20 = vsel %vm154_vm0, %v122_v11, 0.0  ;;  %v125_v22 = vmul.f32 %v3647_v2, %v87_v17  ;;  %v158_v25 = vsel %vm154_vm0, %v123_v16, 0.0  ;;  %v161_v26 = vsel %vm154_vm0, %v124_v21, 0.0  ;;  %v55_v31 = vld [vmem:[%s4841_s1 + $0x20] sm:$0xff]  ;;  %v24_v42 = vld [vmem:[%s4840_s0 + $0x28] sm:$0xff]  ;;  %v25_v52 = vld [vmem:[%s4840_s0 + $0x30] sm:$0xff] }
   0x8   :  { %156 = vadd.xlane.f32.xlu0 %v155_v20  ;;  %v138_v27 = vmul.f32 %v3647_v2, %v100_v13  ;;  %162 = vadd.xlane.f32.xlu1 %v161_v26  ;;  %v101_v32 = vmul.f32 %v68_v24, %v36_v23  ;;  %v103_v35 = vmul.f32 %v70_v33, %v38_v29  ;;  %v39_v37 = vld [vmem:[%s4840_s0 + $0xa0] sm:$0xff]  ;;  %v56_v43 = vld [vmem:[%s4841_s1 + $0x28] sm:$0xff]  ;;  %v57_v53 = vld [vmem:[%s4841_s1 + $0x30] sm:$0xff] }
   0x9   :  { %v164_v34 = vsel %vm154_vm0, %v125_v22, 0.0  ;;  %v71_v38 = vld [vmem:[%s4841_s1 + $0xa0] sm:$0xff]  ;;  %v140_v40 = vmul.f32 %v3647_v2, %v102_v28  ;;  %v88_v41 = vmul.f32 %v55_v31, %v23_v30  ;;  %v40_v47 = vld [vmem:[%s4840_s0 + $0xa8] sm:$0xff]  ;;  %v89_v51 = vmul.f32 %v56_v43, %v24_v42  ;;  %v41_v57 = vld [vmem:[%s4840_s0 + $0xb0] sm:$0xff] }
   0xa   :  { %v139_v36 = vmul.f32 %v3647_v2, %v101_v32  ;;  %v203_v39 = vsel %vm154_vm0, %v138_v27, 0.0  ;;  %v141_v45 = vmul.f32 %v3647_v2, %v103_v35  ;;  %v104_v46 = vmul.f32 %v71_v38, %v39_v37  ;;  %v72_v48 = vld [vmem:[%s4841_s1 + $0xa8] sm:$0xff]  ;;  %v73_v58 = vld [vmem:[%s4841_s1 + $0xb0] sm:$0xff]  ;;  %v26_v62 = vld [vmem:[%s4840_s0 + $0x38] sm:$0xff] }
   0xb   :  { %v209_v49 = vsel %vm154_vm0, %v140_v40, 0.0  ;;  %v126_v50 = vmul.f32 %v3647_v2, %v88_v41  ;;  %v105_v56 = vmul.f32 %v72_v48, %v40_v47  ;;  %v127_v60 = vmul.f32 %v3647_v2, %v89_v51  ;;  %v58_v63 = vld [vmem:[%s4841_s1 + $0x38] sm:$0xff] }
   0xc   :  { %159 = vadd.xlane.f32.xlu0 %v158_v25  ;;  %165 = vadd.xlane.f32.xlu1 %v164_v34  ;;  %v206_v44 = vsel %vm154_vm0, %v139_v36, 0.0  ;;  %v212_v54 = vsel %vm154_vm0, %v141_v45, 0.0  ;;  %v142_v55 = vmul.f32 %v3647_v2, %v104_v46  ;;  %v90_v61 = vmul.f32 %v57_v53, %v25_v52 }
   0xd   :  { %v167_v59 = vsel %vm154_vm0, %v126_v50, 0.0  ;;  %v143_v1 = vmul.f32 %v3647_v2, %v105_v56  ;;  %v106_v3 = vmul.f32 %v73_v58, %v41_v57 }
   0xe   :  { %v215_v0 = vsel %vm154_vm0, %v142_v55, 0.0 }
  0x10   :  { %204 = vadd.xlane.f32.xlu0 %v203_v39  ;;  %207 = vadd.xlane.f32.xlu1 %v206_v44 }
  0x14   :  { %210 = vadd.xlane.f32.xlu0 %v209_v49  ;;  %213 = vadd.xlane.f32.xlu1 %v212_v54 }
  0x15   :  { %10 = vsyncpa [#allocation4], 0  ;;  %v42_v4 = vld [vmem:[%s4840_s0 + $0xb8] sm:$0xff]  ;;  %v170_v6 = vsel %vm154_vm0, %v127_v60, 0.0  ;;  %v128_v7 = vmul.f32 %v3647_v2, %v90_v61  ;;  %v91_v8 = vmul.f32 %v58_v63, %v26_v62  ;;  %v27_v9 = vld [vmem:[%s4840_s0 + $0x40] sm:$0xff]  ;;  %v218_v11 = vsel %vm154_vm0, %v143_v1, 0.0 }
  0x16   :  { %v74_v5 = vld [vmem:[%s4841_s1 + $0xb8] sm:$0xff]  ;;  %v59_v10 = vld [vmem:[%s4841_s1 + $0x40] sm:$0xff]  ;;  %v144_v12 = vmul.f32 %v3647_v2, %v106_v3  ;;  %v28_v19 = vld [vmem:[%s4840_s0 + $0x48] sm:$0xff]  ;;  %vm3208_vm1 = vcmask 130112   ;;  %vm3215_vm2 = vcmask 195712   ;;  %vm3222_vm3 = vcmask 261312  }
  0x17   :  { %v107_v13 = vmul.f32 %v74_v5, %v42_v4  ;;  %v43_v14 = vld [vmem:[%s4840_s0 + $0xc0] sm:$0xff]  ;;  %v173_v16 = vsel %vm154_vm0, %v128_v7, 0.0  ;;  %v129_v17 = vmul.f32 %v3647_v2, %v91_v8  ;;  %v92_v18 = vmul.f32 %v59_v10, %v27_v9  ;;  %v60_v20 = vld [vmem:[%s4841_s1 + $0x48] sm:$0xff]  ;;  %v29_v29 = vld [vmem:[%s4840_s0 + $0x50] sm:$0xff] }
  0x18   :  { %168 = vadd.xlane.f32.xlu0 %v167_v59  ;;  %216 = vadd.xlane.f32.xlu1 %v215_v0  ;;  %v75_v15 = vld [vmem:[%s4841_s1 + $0xc0] sm:$0xff]  ;;  %v221_v21 = vsel %vm154_vm0, %v144_v12, 0.0  ;;  %v44_v24 = vld [vmem:[%s4840_s0 + $0xc8] sm:$0xff]  ;;  %v93_v28 = vmul.f32 %v60_v20, %v28_v19  ;;  %v61_v30 = vld [vmem:[%s4841_s1 + $0x50] sm:$0xff]  ;;  %vm3229_vm4 = vcmask 326912   ;;  %vm3236_vm5 = vcmask 392512  }
  0x19   :  { %v145_v22 = vmul.f32 %v3647_v2, %v107_v13  ;;  %v108_v23 = vmul.f32 %v75_v15, %v43_v14  ;;  %v76_v25 = vld [vmem:[%s4841_s1 + $0xc8] sm:$0xff]  ;;  %v176_v26 = vsel %vm154_vm0, %v129_v17, 0.0  ;;  %v130_v27 = vmul.f32 %v3647_v2, %v92_v18  ;;  %v45_v34 = vld [vmem:[%s4840_s0 + $0xd0] sm:$0xff]  ;;  %v30_v39 = vld [vmem:[%s4840_s0 + $0x58] sm:$0xff] }
  0x1a   :  { %v109_v33 = vmul.f32 %v76_v25, %v44_v24  ;;  %v77_v35 = vld [vmem:[%s4841_s1 + $0xd0] sm:$0xff]  ;;  %v131_v37 = vmul.f32 %v3647_v2, %v93_v28  ;;  %v94_v38 = vmul.f32 %v61_v30, %v29_v29  ;;  %v62_v40 = vld [vmem:[%s4841_s1 + $0x58] sm:$0xff]  ;;  %v31_v49 = vld [vmem:[%s4840_s0 + $0x60] sm:$0xff]  ;;  %vm3243_vm6 = vcmask 458112  }
  0x1b   :  { %v224_v31 = vsel %vm154_vm0, %v145_v22, 0.0  ;;  %v146_v32 = vmul.f32 %v3647_v2, %v108_v23  ;;  %v179_v36 = vsel %vm154_vm0, %v130_v27, 0.0  ;;  %v110_v43 = vmul.f32 %v77_v35, %v45_v34  ;;  %v46_v44 = vld [vmem:[%s4840_s0 + $0xd8] sm:$0xff]  ;;  %v63_v50 = vld [vmem:[%s4841_s1 + $0x60] sm:$0xff]  ;;  %v32_v59 = vld [vmem:[%s4840_s0 + $0x68] sm:$0xff] }
  0x1c   :  { %171 = vadd.xlane.f32.xlu0 %v170_v6  ;;  %219 = vadd.xlane.f32.xlu1 %v218_v11  ;;  %v147_v42 = vmul.f32 %v3647_v2, %v109_v33  ;;  %v78_v45 = vld [vmem:[%s4841_s1 + $0xd8] sm:$0xff]  ;;  %v182_v46 = vsel %vm154_vm0, %v131_v37, 0.0  ;;  %v132_v47 = vmul.f32 %v3647_v2, %v94_v38  ;;  %v95_v48 = vmul.f32 %v62_v40, %v30_v39  ;;  %v47_v54 = vld [vmem:[%s4840_s0 + $0xe0] sm:$0xff]  ;;  %v64_v60 = vld [vmem:[%s4841_s1 + $0x68] sm:$0xff] }
  0x1d   :  { %v227_v41 = vsel %vm154_vm0, %v146_v32, 0.0  ;;  %v148_v52 = vmul.f32 %v3647_v2, %v110_v43  ;;  %v111_v53 = vmul.f32 %v78_v45, %v46_v44  ;;  %v79_v55 = vld [vmem:[%s4841_s1 + $0xe0] sm:$0xff]  ;;  %v96_v58 = vmul.f32 %v63_v50, %v31_v49  ;;  %v48_v0 = vld [vmem:[%s4840_s0 + $0xe8] sm:$0xff]  ;;  %v33_v6 = vld [vmem:[%s4840_s0 + $0x70] sm:$0xff] }
  0x1e   :  { %v230_v51 = vsel %vm154_vm0, %v147_v42, 0.0  ;;  %v185_v56 = vsel %vm154_vm0, %v132_v47, 0.0  ;;  %v133_v57 = vmul.f32 %v3647_v2, %v95_v48  ;;  %v112_v63 = vmul.f32 %v79_v55, %v47_v54  ;;  %v80_v1 = vld [vmem:[%s4841_s1 + $0xe8] sm:$0xff]  ;;  %v65_v7 = vld [vmem:[%s4841_s1 + $0x70] sm:$0xff]  ;;  %v66_v17 = vld [vmem:[%s4841_s1 + $0x78] sm:$0xff] }
  0x1f   :  { %v233_v61 = vsel %vm154_vm0, %v148_v52, 0.0  ;;  %v149_v62 = vmul.f32 %v3647_v2, %v111_v53  ;;  %v134_v4 = vmul.f32 %v3647_v2, %v96_v58  ;;  %v97_v5 = vmul.f32 %v64_v60, %v32_v59  ;;  %v49_v11 = vld [vmem:[%s4840_s0 + $0xf0] sm:$0xff]  ;;  %v82_v22 = vld [vmem:[%s4841_s1 + $0xf8] sm:$0xff] }
  0x20   :  { %174 = vadd.xlane.f32.xlu0 %v173_v16  ;;  %222 = vadd.xlane.f32.xlu1 %v221_v21  ;;  %v188_v3 = vsel %vm154_vm0, %v133_v57, 0.0  ;;  %v150_v9 = vmul.f32 %v3647_v2, %v112_v63  ;;  %v113_v10 = vmul.f32 %v80_v1, %v48_v0  ;;  %v81_v12 = vld [vmem:[%s4841_s1 + $0xf0] sm:$0xff]  ;;  %v98_v15 = vmul.f32 %v65_v7, %v33_v6  ;;  %v34_v16 = vld [vmem:[%s4840_s0 + $0x78] sm:$0xff] }
  0x21   :  { %v236_v8 = vsel %vm154_vm0, %v149_v62, 0.0  ;;  %v191_v13 = vsel %vm154_vm0, %v134_v4, 0.0  ;;  %v135_v14 = vmul.f32 %v3647_v2, %v97_v5  ;;  %v114_v20 = vmul.f32 %v81_v12, %v49_v11  ;;  %v50_v21 = vld [vmem:[%s4840_s0 + $0xf8] sm:$0xff] }
  0x22   :  { %v239_v18 = vsel %vm154_vm0, %v150_v9, 0.0  ;;  %v151_v19 = vmul.f32 %v3647_v2, %v113_v10  ;;  %v136_v24 = vmul.f32 %v3647_v2, %v98_v15  ;;  %v99_v25 = vmul.f32 %v66_v17, %v34_v16 }
  0x23   :  { %v194_v23 = vsel %vm154_vm0, %v135_v14, 0.0  ;;  %v152_v27 = vmul.f32 %v3647_v2, %v114_v20  ;;  %v115_v28 = vmul.f32 %v82_v22, %v50_v21  ;;  %v3610_v33 = vmov 0  }
  0x24   :  { %177 = vadd.xlane.f32.xlu0 %v176_v26  ;;  %225 = vadd.xlane.f32.xlu1 %v224_v31  ;;  %v242_v26 = vsel %vm154_vm0, %v151_v19, 0.0  ;;  %v197_v29 = vsel %vm154_vm0, %v136_v24, 0.0  ;;  %v137_v30 = vmul.f32 %v3647_v2, %v99_v25  ;;  %v509_v6 = vlaneseq }
  0x25   :  { %v245_v31 = vsel %vm154_vm0, %v152_v27, 0.0  ;;  %v153_v32 = vmul.f32 %v3647_v2, %v115_v28  ;;  %3459 = vset.pattern.permute.xlu1 %v3610_v33  ;;  %3458 = vset.pattern.permute.xlu0 %v3610_v33  ;;  %vm3250_vm7 = vcmask 523712   ;;  %vm3257_vm8 = vcmask 589312  }
  0x26   :  { %v200_v34 = vsel %vm154_vm0, %v137_v30, 0.0  ;;  %v3917_v17 = vshrl.u32 %v509_v6, 7  ;;  %vm3264_vm9 = vcmask 654912   ;;  %vm3271_vm10 = vcmask 720512  }
  0x27   :  { %v248_v35 = vsel %vm154_vm0, %v153_v32, 0.0  ;;  %vm3278_vm11 = vcmask 786112   ;;  %vm3285_vm12 = vcmask 851712   ;;  %vm3292_vm13 = vcmask 917312  }
  0x28   :  { %180 = vadd.xlane.f32.xlu0 %v179_v36  ;;  %228 = vadd.xlane.f32.xlu1 %v227_v41  ;;  %v3902_v36 = vstv %s4843_s3  ;;  %v3922_v30 = vsub.s32 0, %v3917_v17  ;;  %vm3299_vm14 = vcmask 982912   ;;  %vm3306_vm15 = vcmask 1048512   ;;  %s3612_s3 = smov [#allocation3]  }
  0x29   :  { %s3414_s10 = sshll.u32 %s3612_s3, 4  ;;  %vm3405_vm0 = vcmp.lt.s32.totalorder %v509_v6, 256  ;;  %s3415_s10 = int_to_ptr.vmem [resolvable:$true] %s3414_s10 }
  0x2a   :  { %s3588_s11 = scalar_lea.vmem %s3415_s10, 32  ;;  %p3593_p1 = scmp.lt.s32.totalorder %s3415_s10, %s3415_s10 }
  0x2b   :  { %p3589_p0 = scmp.ne.s32.totalorder %s3415_s10, %s3588_s11  ;;  %p3594_p2 = scmp.lt.s32.totalorder %s3588_s11, %s3588_s11 }
  0x2c   :  { %183 = vadd.xlane.f32.xlu0 %v182_v46  ;;  %231 = vadd.xlane.f32.xlu1 %v230_v51 }
  0x2d   :  { %p3595_p3 = por %p3594_p2, %p3593_p1 }
  0x2f   :  { %p3596_p4 = pnand %p3595_p3, %p3589_p0 }
  0x30   :  { %186 = vadd.xlane.f32.xlu0 %v185_v56  ;;  %234 = vadd.xlane.f32.xlu1 %v233_v61 }
  0x34   :  { %189 = vadd.xlane.f32.xlu0 %v188_v3  ;;  %237 = vadd.xlane.f32.xlu1 %v236_v8 }
  0x38   :  { %192 = vadd.xlane.f32.xlu0 %v191_v13  ;;  %240 = vadd.xlane.f32.xlu1 %v239_v18 }
  0x3c   :  { %195 = vadd.xlane.f32.xlu0 %v194_v23  ;;  %243 = vadd.xlane.f32.xlu1 %v242_v26  ;;  %v3611_v23 = vmov 1966171168  }
  0x3d   :  { %v1538_v24 = vunpack.c.l.s4 %v3611_v23 }
  0x40   :  { %198 = vadd.xlane.f32.xlu0 %v197_v29  ;;  %246 = vadd.xlane.f32.xlu1 %v245_v31 }
  0x44   :  { %201 = vadd.xlane.f32.xlu0 %v200_v34  ;;  %249 = vadd.xlane.f32.xlu1 %v248_v35  ;;  %v3926_v35 = vsub.s32 1, %v3917_v17 }
  0x91   :  { %v157_v37 = vpop.xlane.xlu0 %156  ;;  %v163_v2 = vpop.xlane.xlu1 %162 }
  0x92   :  { %v253_v38 = vadd.f32 %v3902_v36, %v157_v37  ;;  %v255_v40 = vadd.f32 %v3902_v36, %v163_v2  ;;  %v3929_v37 = vsub.s32 2, %v3917_v17 }
  0x94   :  { %v3423_v39 = vmul.f32 -1.442695, %v253_v38  ;;  %v3425_v43 = vmul.f32 -1.442695, %v255_v40  ;;  %v1539_v38 = vunpack.c.0.s8 %v1538_v24 }
  0x95   :  { %v160_v41 = vpop.xlane.xlu0 %159  ;;  %v166_v44 = vpop.xlane.xlu1 %165 }
  0x96   :  { %3460 = vpow2.f32 %v3423_v39  ;;  %v254_v42 = vadd.f32 %v3902_v36, %v160_v41  ;;  %v256_v46 = vadd.f32 %v3902_v36, %v166_v44  ;;  %v3933_v44 = vsub.s32 3, %v3917_v17 }
  0x97   :  { %3462 = vpow2.f32 %v3425_v43 }
  0x98   :  { %v3424_v45 = vmul.f32 -1.442695, %v254_v42  ;;  %v3426_v49 = vmul.f32 -1.442695, %v256_v46  ;;  %v3939_v46 = vsub.s32 5, %v3917_v17 }
  0x99   :  { %v205_v47 = vpop.xlane.xlu0 %204  ;;  %v208_v50 = vpop.xlane.xlu1 %207 }
  0x9a   :  { %3464 = vpow2.f32 %v3424_v45  ;;  %v269_v48 = vadd.f32 %v3902_v36, %v205_v47  ;;  %v270_v52 = vadd.f32 %v3902_v36, %v208_v50  ;;  %v3936_v45 = vsub.s32 4, %v3917_v17 }
  0x9b   :  { %3466 = vpow2.f32 %v3426_v49  ;;  %v3943_v49 = vsub.s32 6, %v3917_v17 }
  0x9c   :  { %v3439_v51 = vmul.f32 -1.442695, %v269_v48  ;;  %v3440_v55 = vmul.f32 -1.442695, %v270_v52  ;;  %v3949_v52 = vsub.s32 %v1539_v38, %v3917_v17 }
  0x9d   :  { %v211_v53 = vpop.xlane.xlu0 %210  ;;  %v214_v56 = vpop.xlane.xlu1 %213 }
  0x9e   :  { %3468 = vpow2.f32 %v3439_v51  ;;  %v271_v54 = vadd.f32 %v3902_v36, %v211_v53  ;;  %v272_v58 = vadd.f32 %v3902_v36, %v214_v56  ;;  %v3946_v51 = vsub.s32 7, %v3917_v17 }
  0x9f   :  { %3470 = vpow2.f32 %v3440_v55 }
  0xa0   :  { %v3441_v57 = vmul.f32 -1.442695, %v271_v54  ;;  %v3442_v61 = vmul.f32 -1.442695, %v272_v58 }
  0xa1   :  { %v169_v59 = vpop.xlane.xlu0 %168  ;;  %v217_v63 = vpop.xlane.xlu1 %216 }
  0xa2   :  { %3472 = vpow2.f32 %v3441_v57  ;;  %v257_v60 = vadd.f32 %v3902_v36, %v169_v59  ;;  %v273_v3 = vadd.f32 %v3902_v36, %v217_v63 }
  0xa3   :  { %v3461_v62 = vpop.eup %3460  ;;  %3474 = vpow2.f32 %v3442_v61 }
  0xa4   :  { %v381_v0 = vadd.f32 1.0, %v3461_v62  ;;  %v3427_v1 = vmul.f32 -1.442695, %v257_v60  ;;  %v3463_v4 = vpop.eup %3462  ;;  %v3443_v9 = vmul.f32 -1.442695, %v273_v3 }
  0xa5   :  { %v172_v5 = vpop.xlane.xlu0 %171  ;;  %v383_v7 = vadd.f32 1.0, %v3463_v4  ;;  %v220_v11 = vpop.xlane.xlu1 %219 }
  0xa6   :  { %3476 = vrcp.f32 %v381_v0  ;;  %v258_v8 = vadd.f32 %v3902_v36, %v172_v5  ;;  %v274_v14 = vadd.f32 %v3902_v36, %v220_v11 }
  0xa7   :  { %v3465_v10 = vpop.eup %3464  ;;  %3478 = vpow2.f32 %v3427_v1 }
  0xa8   :  { %v382_v12 = vadd.f32 1.0, %v3465_v10  ;;  %3480 = vrcp.f32 %v383_v7  ;;  %v3428_v13 = vmul.f32 -1.442695, %v258_v8  ;;  %v3467_v15 = vpop.eup %3466  ;;  %v3444_v20 = vmul.f32 -1.442695, %v274_v14 }
  0xa9   :  { %v175_v16 = vpop.xlane.xlu0 %174  ;;  %3482 = vpow2.f32 %v3443_v9  ;;  %v384_v18 = vadd.f32 1.0, %v3467_v15  ;;  %v223_v22 = vpop.xlane.xlu1 %222 }
  0xaa   :  { %3484 = vrcp.f32 %v382_v12  ;;  %v259_v19 = vadd.f32 %v3902_v36, %v175_v16  ;;  %v275_v27 = vadd.f32 %v3902_v36, %v223_v22 }
  0xab   :  { %v3469_v21 = vpop.eup %3468  ;;  %3486 = vpow2.f32 %v3428_v13 }
  0xac   :  { %v397_v25 = vadd.f32 1.0, %v3469_v21  ;;  %3488 = vrcp.f32 %v384_v18  ;;  %v3429_v26 = vmul.f32 -1.442695, %v259_v19  ;;  %v3471_v28 = vpop.eup %3470  ;;  %v3445_v33 = vmul.f32 -1.442695, %v275_v27 }
  0xad   :  { %v178_v29 = vpop.xlane.xlu0 %177  ;;  %3490 = vpow2.f32 %v3444_v20  ;;  %v398_v31 = vadd.f32 1.0, %v3471_v28  ;;  %v226_v2 = vpop.xlane.xlu1 %225 }
  0xae   :  { %3492 = vrcp.f32 %v397_v25  ;;  %v260_v32 = vadd.f32 %v3902_v36, %v178_v29  ;;  %v276_v41 = vadd.f32 %v3902_v36, %v226_v2 }
  0xaf   :  { %v3473_v34 = vpop.eup %3472  ;;  %3494 = vpow2.f32 %v3429_v26 }
  0xb0   :  { %v399_v39 = vadd.f32 1.0, %v3473_v34  ;;  %3496 = vrcp.f32 %v398_v31  ;;  %v3430_v40 = vmul.f32 -1.442695, %v260_v32  ;;  %v3475_v42 = vpop.eup %3474  ;;  %v3446_v53 = vmul.f32 -1.442695, %v276_v41 }
  0xb1   :  { %v181_v43 = vpop.xlane.xlu0 %180  ;;  %3498 = vpow2.f32 %v3445_v33  ;;  %v400_v47 = vadd.f32 1.0, %v3475_v42 }
  0xb2   :  { %3500 = vrcp.f32 %v399_v39  ;;  %v261_v48 = vadd.f32 %v3902_v36, %v181_v43 }
  0xb3   :  { %v3477_v50 = vpop.eup %3476  ;;  %3502 = vpow2.f32 %v3430_v40 }
  0xb4   :  { %v3479_v54 = vpop.eup %3478  ;;  %3504 = vrcp.f32 %v400_v47  ;;  %v3431_v55 = vmul.f32 -1.442695, %v261_v48  ;;  %v512_v56 = vrot.slane %v3477_v50, %v3922_v30  ;;  %v516_v57 = vrot.slane %v3477_v50, %v3926_v35  ;;  %v229_v47 = vpop.xlane.xlu1 %228 }
  0xb5   :  { %v3953_v58 = vpop.eup %3480  ;;  %v385_v59 = vadd.f32 1.0, %v3479_v54  ;;  %v184_v60 = vpop.xlane.xlu0 %183  ;;  %v520_v61 = vrot.slane %v3477_v50, %v3929_v37  ;;  %v524_v62 = vrot.slane %v3477_v50, %v3933_v44  ;;  %v528_v63 = vrot.slane %v3477_v50, %v3936_v45 }
  0xb6   :  { %v3483_v0 = vpop.eup %3482  ;;  %3506 = vpow2.f32 %v3431_v55  ;;  %v262_v1 = vadd.f32 %v3902_v36, %v184_v60  ;;  %v532_v3 = vrot.slane %v3477_v50, %v3939_v46  ;;  %v536_v4 = vrot.slane %v3477_v50, %v3943_v49 }
  0xb7   :  { %v3485_v5 = vpop.eup %3484  ;;  %3508 = vrcp.f32 %v385_v59  ;;  %v401_v7 = vadd.f32 1.0, %v3483_v0  ;;  %v540_v8 = vrot.slane %v3477_v50, %v3946_v51  ;;  %v1533_v9 = vcombine.low %v512_v56, %v516_v57 }
  0xb8   :  { %v3487_v10 = vpop.eup %3486  ;;  %v3432_v11 = vmul.f32 -1.442695, %v262_v1  ;;  %v1534_v12 = vcombine.low %v520_v61, %v524_v62  ;;  %v1535_v13 = vcombine.low %v528_v63, %v532_v3  ;;  %3510 = vpow2.f32 %v3446_v53 }
  0xb9   :  { %v3962_v14 = vpop.eup %3488  ;;  %v386_v15 = vadd.f32 1.0, %v3487_v10  ;;  %3512 = vrcp.f32 %v401_v7  ;;  %v187_v16 = vpop.xlane.xlu0 %186  ;;  %v1536_v18 = vcombine.low %v536_v4, %v540_v8  ;;  %v1543_v19 = vrot.slane %v1533_v9, %v3949_v52 }
  0xba   :  { %v3491_v20 = vpop.eup %3490  ;;  %3514 = vpow2.f32 %v3432_v11  ;;  %v263_v21 = vadd.f32 %v3902_v36, %v187_v16  ;;  %v1550_v22 = vrot.slane %v1534_v12, %v3949_v52  ;;  %v1557_v23 = vrot.slane %v1535_v13, %v3949_v52 }
  0xbb   :  { %v3968_v24 = vpop.eup %3492  ;;  %3516 = vrcp.f32 %v386_v15  ;;  %v402_v25 = vadd.f32 1.0, %v3491_v20  ;;  %v1564_v26 = vrot.slane %v1536_v18, %v3949_v52  ;;  %v544_v27 = vrot.slane %v3485_v5, %v3922_v30 }
  0xbc   :  { %v3495_v28 = vpop.eup %3494  ;;  %v3433_v29 = vmul.f32 -1.442695, %v263_v21  ;;  %v1565_v31 = vcombine.low %v1543_v19, %v1550_v22  ;;  %v548_v32 = vrot.slane %v3485_v5, %v3926_v35  ;;  %v552_v33 = vrot.slane %v3485_v5, %v3929_v37 }
  0xbd   :  { %v3974_v34 = vpop.eup %3496  ;;  %v387_v38 = vadd.f32 1.0, %v3495_v28  ;;  %3518 = vrcp.f32 %v402_v25  ;;  %v1566_v2 = vcombine.low %v1557_v23, %v1564_v26  ;;  %v556_v39 = vrot.slane %v3485_v5, %v3933_v44 }
  0xbe   :  { %v3499_v40 = vpop.eup %3498  ;;  %3520 = vpow2.f32 %v3433_v29  ;;  %v1573_v41 = vrot.slane %v1565_v31, %v3949_v52  ;;  %v560_v42 = vrot.slane %v3485_v5, %v3936_v45  ;;  %v564_v43 = vrot.slane %v3485_v5, %v3939_v46 }
  0xbf   :  { %v3980_v48 = vpop.eup %3500  ;;  %3522 = vrcp.f32 %v387_v38  ;;  %v403_v50 = vadd.f32 1.0, %v3499_v40  ;;  %v1580_v53 = vrot.slane %v1566_v2, %v3949_v52  ;;  %v568_v54 = vrot.slane %v3485_v5, %v3943_v49 }
  0xc0   :  { %v3503_v55 = vpop.eup %3502  ;;  %v572_v56 = vrot.slane %v3485_v5, %v3946_v51  ;;  %v1582_v57 = vcombine.low %v544_v27, %v548_v32  ;;  %v1583_v59 = vcombine.low %v552_v33, %v556_v39  ;;  %v1584_v60 = vcombine.low %v560_v42, %v564_v43  ;;  %v232_v27 = vpop.xlane.xlu1 %231 }
  0xc1   :  { %v3985_v61 = vpop.eup %3504  ;;  %v388_v62 = vadd.f32 1.0, %v3503_v55  ;;  %3524 = vrcp.f32 %v403_v50  ;;  %v1581_v63 = vcombine.low %v1573_v41, %v1580_v53  ;;  %v277_v0 = vadd.f32 %v3902_v36, %v229_v47 }
  0xc2   :  { %v1585_v1 = vcombine.low %v568_v54, %v572_v56  ;;  %v1592_v3 = vrot.slane %v1582_v57, %v3949_v52  ;;  %v1599_v4 = vrot.slane %v1583_v59, %v3949_v52  ;;  %v1606_v7 = vrot.slane %v1584_v60, %v3949_v52 }
  0xc3   :  { %v3507_v8 = vpop.eup %3506  ;;  %3526 = vrcp.f32 %v388_v62  ;;  %3102 = vperm.xlu0 %3458, %v1581_v63   ;;  %v3447_v5 = vmul.f32 -1.442695, %v277_v0  ;;  %v576_v9 = vrot.slane %v3953_v58, %v3922_v30  ;;  %v580_v10 = vrot.slane %v3953_v58, %v3926_v35 }
  0xc4   :  { %v3995_v11 = vpop.eup %3508  ;;  %v389_v12 = vadd.f32 1.0, %v3507_v8  ;;  %v1613_v13 = vrot.slane %v1585_v1, %v3949_v52  ;;  %v1614_v15 = vcombine.low %v1592_v3, %v1599_v4  ;;  %v584_v16 = vrot.slane %v3953_v58, %v3929_v37  ;;  %v235_v4 = vpop.xlane.xlu1 %234 }
  0xc5   :  { %v3511_v18 = vpop.eup %3510  ;;  %3528 = vpow2.f32 %v3447_v5  ;;  %v588_v19 = vrot.slane %v3953_v58, %v3933_v44  ;;  %v592_v20 = vrot.slane %v3953_v58, %v3936_v45  ;;  %v596_v21 = vrot.slane %v3953_v58, %v3939_v46 }
  0xc6   :  { %v4006_v22 = vpop.eup %3512  ;;  %3530 = vrcp.f32 %v389_v12  ;;  %v404_v23 = vadd.f32 1.0, %v3511_v18  ;;  %v1615_v25 = vcombine.low %v1606_v7, %v1613_v13  ;;  %v1622_v26 = vrot.slane %v1614_v15, %v3949_v52 }
  0xc7   :  { %v3515_v28 = vpop.eup %3514  ;;  %v600_v29 = vrot.slane %v3953_v58, %v3943_v49  ;;  %v604_v31 = vrot.slane %v3953_v58, %v3946_v51  ;;  %v1631_v32 = vcombine.low %v576_v9, %v580_v10  ;;  %v1632_v33 = vcombine.low %v584_v16, %v588_v19 }
  0xc8   :  { %v4013_v38 = vpop.eup %3516  ;;  %v390_v2 = vadd.f32 1.0, %v3515_v28  ;;  %3532 = vrcp.f32 %v404_v23  ;;  %v1629_v39 = vrot.slane %v1615_v25, %v3949_v52  ;;  %v1633_v40 = vcombine.low %v592_v20, %v596_v21 }
  0xc9   :  { %v1634_v41 = vcombine.low %v600_v29, %v604_v31  ;;  %v1641_v42 = vrot.slane %v1631_v32, %v3949_v52  ;;  %v1648_v43 = vrot.slane %v1632_v33, %v3949_v52  ;;  %v278_v47 = vadd.f32 %v3902_v36, %v232_v27 }
  0xca   :  { %v4019_v50 = vpop.eup %3518  ;;  %3534 = vrcp.f32 %v390_v2  ;;  %v1630_v58 = vcombine.low %v1622_v26, %v1629_v39  ;;  %v1655_v53 = vrot.slane %v1633_v40, %v3949_v52  ;;  %v608_v54 = vrot.slane %v3962_v14, %v3922_v30 }
  0xcb   :  { %v3521_v55 = vpop.eup %3520  ;;  %v1662_v56 = vrot.slane %v1634_v41, %v3949_v52  ;;  %v1663_v57 = vcombine.low %v1641_v42, %v1648_v43  ;;  %v3448_v59 = vmul.f32 -1.442695, %v278_v47  ;;  %v612_v60 = vrot.slane %v3962_v14, %v3926_v35  ;;  %v238_v47 = vpop.xlane.xlu1 %237 }
  0xcc   :  { %v4027_v62 = vpop.eup %3522  ;;  %v391_v63 = vadd.f32 1.0, %v3521_v55  ;;  %3105 = vperm.xlu1 %3459, %v1630_v58   ;;  %v616_v0 = vrot.slane %v3962_v14, %v3929_v37  ;;  %v620_v1 = vrot.slane %v3962_v14, %v3933_v44  ;;  %v624_v3 = vrot.slane %v3962_v14, %v3936_v45 }
  0xcd   :  { %v1664_v7 = vcombine.low %v1655_v53, %v1662_v56  ;;  %v1671_v8 = vrot.slane %v1663_v57, %v3949_v52  ;;  %3536 = vpow2.f32 %v3448_v59  ;;  %v628_v5 = vrot.slane %v3962_v14, %v3939_v46  ;;  %v190_v56 = vpop.xlane.xlu0 %189 }
  0xce   :  { %v4038_v9 = vpop.eup %3524  ;;  %3538 = vrcp.f32 %v391_v63  ;;  %v632_v10 = vrot.slane %v3962_v14, %v3943_v49  ;;  %v636_v12 = vrot.slane %v3962_v14, %v3946_v51  ;;  %v1680_v13 = vcombine.low %v608_v54, %v612_v60 }
  0xcf   :  { %v1678_v15 = vrot.slane %v1664_v7, %v3949_v52  ;;  %v1681_v16 = vcombine.low %v616_v0, %v620_v1  ;;  %v1682_v18 = vcombine.low %v624_v3, %v628_v5  ;;  %v279_v19 = vadd.f32 %v3902_v36, %v235_v4 }
  0xd0   :  { %v4046_v20 = vpop.eup %3526  ;;  %v1683_v21 = vcombine.low %v632_v10, %v636_v12  ;;  %v1690_v23 = vrot.slane %v1680_v13, %v3949_v52  ;;  %v640_v25 = vrot.slane %v3995_v11, %v3922_v30  ;;  %v644_v26 = vrot.slane %v3995_v11, %v3926_v35 }
  0xd1   :  { %v1679_v27 = vcombine.low %v1671_v8, %v1678_v15  ;;  %v1697_v14 = vrot.slane %v1681_v16, %v3949_v52  ;;  %v1704_v28 = vrot.slane %v1682_v18, %v3949_v52  ;;  %v3449_v29 = vmul.f32 -1.442695, %v279_v19 }
  0xd2   :  { %v3529_v31 = vpop.eup %3528  ;;  %v1711_v32 = vrot.slane %v1683_v21, %v3949_v52  ;;  %v648_v33 = vrot.slane %v3995_v11, %v3929_v37  ;;  %v652_v2 = vrot.slane %v3995_v11, %v3933_v44  ;;  %v656_v39 = vrot.slane %v3995_v11, %v3936_v45 }
  0xd3   :  { %v4062_v40 = vpop.eup %3530  ;;  %v405_v41 = vadd.f32 1.0, %v3529_v31  ;;  %3108 = vperm.xlu1 %3459, %v1679_v27   ;;  %v1712_v42 = vcombine.low %v1690_v23, %v1697_v14  ;;  %3540 = vpow2.f32 %v3449_v29  ;;  %v660_v43 = vrot.slane %v3995_v11, %v3939_v46  ;;  %v193_v29 = vpop.xlane.xlu0 %192 }
  0xd4   :  { %v1713_v58 = vcombine.low %v1704_v28, %v1711_v32  ;;  %v664_v53 = vrot.slane %v3995_v11, %v3943_v49  ;;  %v668_v54 = vrot.slane %v3995_v11, %v3946_v51  ;;  %v1729_v55 = vcombine.low %v640_v25, %v644_v26  ;;  %v241_v28 = vpop.xlane.xlu1 %240 }
  0xd5   :  { %v4070_v57 = vpop.eup %3532  ;;  %3542 = vrcp.f32 %v405_v41  ;;  %v1720_v59 = vrot.slane %v1712_v42, %v3949_v52  ;;  %v1730_v60 = vcombine.low %v648_v33, %v652_v2  ;;  %v1731_v63 = vcombine.low %v656_v39, %v660_v43 }
  0xd6   :  { %v1727_v0 = vrot.slane %v1713_v58, %v3949_v52  ;;  %v1732_v1 = vcombine.low %v664_v53, %v668_v54  ;;  %v1739_v3 = vrot.slane %v1729_v55, %v3949_v52  ;;  %v280_v4 = vadd.f32 %v3902_v36, %v238_v47 }
  0xd7   :  { %v4076_v7 = vpop.eup %3534  ;;  %v1746_v11 = vrot.slane %v1730_v60, %v3949_v52  ;;  %v1753_v8 = vrot.slane %v1731_v63, %v3949_v52  ;;  %v264_v5 = vadd.f32 %v3902_v36, %v190_v56  ;;  %v672_v10 = vrot.slane %v4013_v38, %v3922_v30 }
  0xd8   :  { %v1728_v12 = vcombine.low %v1720_v59, %v1727_v0  ;;  %v1760_v13 = vrot.slane %v1732_v1, %v3949_v52  ;;  %v3450_v15 = vmul.f32 -1.442695, %v280_v4  ;;  %v676_v16 = vrot.slane %v4013_v38, %v3926_v35 }
  0xd9   :  { %v1761_v18 = vcombine.low %v1739_v3, %v1746_v11  ;;  %v3434_v19 = vmul.f32 -1.442695, %v264_v5  ;;  %v680_v21 = vrot.slane %v4013_v38, %v3929_v37  ;;  %v684_v23 = vrot.slane %v4013_v38, %v3933_v44 }
  0xda   :  { %v3537_v25 = vpop.eup %3536  ;;  %3111 = vperm.xlu1 %3459, %v1728_v12   ;;  %v1762_v26 = vcombine.low %v1753_v8, %v1760_v13  ;;  %3544 = vpow2.f32 %v3450_v15  ;;  %v688_v27 = vrot.slane %v4013_v38, %v3936_v45  ;;  %v692_v14 = vrot.slane %v4013_v38, %v3939_v46  ;;  %v244_v13 = vpop.xlane.xlu1 %243 }
  0xdb   :  { %v4094_v31 = vpop.eup %3538  ;;  %v406_v32 = vadd.f32 1.0, %v3537_v25  ;;  %v1769_v33 = vrot.slane %v1761_v18, %v3949_v52  ;;  %3546 = vpow2.f32 %v3434_v19  ;;  %v696_v2 = vrot.slane %v4013_v38, %v3943_v49 }
  0xdc   :  { %v1776_v39 = vrot.slane %v1762_v26, %v3949_v52  ;;  %v700_v41 = vrot.slane %v4013_v38, %v3946_v51  ;;  %v1778_v42 = vcombine.low %v672_v10, %v676_v16  ;;  %v1779_v43 = vcombine.low %v680_v21, %v684_v23  ;;  %v196_v21 = vpop.xlane.xlu0 %195 }
  0xdd   :  { %3548 = vrcp.f32 %v406_v32  ;;  %v1780_v47 = vcombine.low %v688_v27, %v692_v14  ;;  %v281_v58 = vadd.f32 %v3902_v36, %v241_v28  ;;  %v265_v53 = vadd.f32 %v3902_v36, %v193_v29 }
  0xde   :  { %v1777_v54 = vcombine.low %v1769_v33, %v1776_v39  ;;  %v1781_v55 = vcombine.low %v696_v2, %v700_v41  ;;  %v1788_v56 = vrot.slane %v1778_v42, %v3949_v52  ;;  %v1795_v59 = vrot.slane %v1779_v43, %v3949_v52 }
  0xdf   :  { %v1802_v60 = vrot.slane %v1780_v47, %v3949_v52  ;;  %v3451_v63 = vmul.f32 -1.442695, %v281_v58  ;;  %v3435_v0 = vmul.f32 -1.442695, %v265_v53  ;;  %v704_v38 = vrot.slane %v4027_v62, %v3922_v30 }
  0xe0   :  { %v3541_v1 = vpop.eup %3540  ;;  %3114 = vperm.xlu1 %3459, %v1777_v54   ;;  %v1809_v3 = vrot.slane %v1781_v55, %v3949_v52  ;;  %v1810_v4 = vcombine.low %v1788_v56, %v1795_v59  ;;  %v708_v11 = vrot.slane %v4027_v62, %v3926_v35  ;;  %v712_v8 = vrot.slane %v4027_v62, %v3929_v37 }
  0xe1   :  { %v407_v5 = vadd.f32 1.0, %v3541_v1  ;;  %3550 = vpow2.f32 %v3451_v63  ;;  %v716_v10 = vrot.slane %v4027_v62, %v3933_v44  ;;  %v720_v12 = vrot.slane %v4027_v62, %v3936_v45 }
  0xe2   :  { %v4118_v15 = vpop.eup %3542  ;;  %v1811_v16 = vcombine.low %v1802_v60, %v1809_v3  ;;  %v1818_v18 = vrot.slane %v1810_v4, %v3949_v52  ;;  %3552 = vpow2.f32 %v3435_v0  ;;  %v724_v19 = vrot.slane %v4027_v62, %v3939_v46  ;;  %v247_v3 = vpop.xlane.xlu1 %246 }
  0xe3   :  { %3554 = vrcp.f32 %v407_v5  ;;  %v728_v23 = vrot.slane %v4027_v62, %v3943_v49  ;;  %v732_v25 = vrot.slane %v4027_v62, %v3946_v51  ;;  %v1827_v26 = vcombine.low %v704_v38, %v708_v11  ;;  %v199_v4 = vpop.xlane.xlu0 %198 }
  0xe4   :  { %v1825_v27 = vrot.slane %v1811_v16, %v3949_v52  ;;  %v1828_v14 = vcombine.low %v712_v8, %v716_v10  ;;  %v1829_v28 = vcombine.low %v720_v12, %v724_v19  ;;  %v282_v29 = vadd.f32 %v3902_v36, %v244_v13 }
  0xe5   :  { %v1830_v32 = vcombine.low %v728_v23, %v732_v25  ;;  %v1837_v33 = vrot.slane %v1827_v26, %v3949_v52  ;;  %v266_v2 = vadd.f32 %v3902_v36, %v196_v21  ;;  %v736_v39 = vrot.slane %v4046_v20, %v3922_v30 }
  0xe6   :  { %v1826_v41 = vcombine.low %v1818_v18, %v1825_v27  ;;  %v1844_v42 = vrot.slane %v1828_v14, %v3949_v52  ;;  %v1851_v62 = vrot.slane %v1829_v28, %v3949_v52  ;;  %v3452_v43 = vmul.f32 -1.442695, %v282_v29 }
  0xe7   :  { %v3545_v47 = vpop.eup %3544  ;;  %v1858_v58 = vrot.slane %v1830_v32, %v3949_v52  ;;  %v3436_v53 = vmul.f32 -1.442695, %v266_v2  ;;  %v740_v54 = vrot.slane %v4046_v20, %v3926_v35  ;;  %v744_v55 = vrot.slane %v4046_v20, %v3929_v37 }
  0xe8   :  { %v3547_v56 = vpop.eup %3546  ;;  %v408_v59 = vadd.f32 1.0, %v3545_v47  ;;  %3117 = vperm.xlu1 %3459, %v1826_v41   ;;  %v1859_v60 = vcombine.low %v1837_v33, %v1844_v42  ;;  %3556 = vpow2.f32 %v3452_v43  ;;  %v748_v63 = vrot.slane %v4046_v20, %v3933_v44 }
  0xe9   :  { %v392_v0 = vadd.f32 1.0, %v3547_v56  ;;  %v1860_v38 = vcombine.low %v1851_v62, %v1858_v58  ;;  %3558 = vpow2.f32 %v3436_v53  ;;  %v752_v1 = vrot.slane %v4046_v20, %v3936_v45 }
  0xea   :  { %v4144_v11 = vpop.eup %3548  ;;  %3560 = vrcp.f32 %v408_v59  ;;  %v1867_v8 = vrot.slane %v1859_v60, %v3949_v52  ;;  %v756_v5 = vrot.slane %v4046_v20, %v3939_v46  ;;  %v760_v10 = vrot.slane %v4046_v20, %v3943_v49  ;;  %v250_v59 = vpop.xlane.xlu1 %249 }
  0xeb   :  { %3562 = vrcp.f32 %v392_v0  ;;  %v1874_v12 = vrot.slane %v1860_v38, %v3949_v52  ;;  %v764_v13 = vrot.slane %v4046_v20, %v3946_v51  ;;  %v1876_v16 = vcombine.low %v736_v39, %v740_v54  ;;  %v202_v60 = vpop.xlane.xlu0 %201 }
  0xec   :  { %v1877_v18 = vcombine.low %v744_v55, %v748_v63  ;;  %v1878_v19 = vcombine.low %v752_v1, %v756_v5  ;;  %v283_v21 = vadd.f32 %v3902_v36, %v247_v3  ;;  %v267_v23 = vadd.f32 %v3902_v36, %v199_v4 }
  0xed   :  { %v1875_v25 = vcombine.low %v1867_v8, %v1874_v12  ;;  %v1879_v26 = vcombine.low %v760_v10, %v764_v13  ;;  %v1886_v27 = vrot.slane %v1876_v16, %v3949_v52  ;;  %v768_v14 = vrot.slane %v4062_v40, %v3922_v30 }
  0xee   :  { %v3551_v28 = vpop.eup %3550  ;;  %v1893_v29 = vrot.slane %v1877_v18, %v3949_v52  ;;  %v1900_v32 = vrot.slane %v1878_v19, %v3949_v52  ;;  %v3453_v20 = vmul.f32 -1.442695, %v283_v21  ;;  %v3437_v33 = vmul.f32 -1.442695, %v267_v23 }
  0xef   :  { %v3553_v2 = vpop.eup %3552  ;;  %v409_v39 = vadd.f32 1.0, %v3551_v28  ;;  %3120 = vperm.xlu1 %3459, %v1875_v25   ;;  %v1907_v41 = vrot.slane %v1879_v26, %v3949_v52  ;;  %v772_v42 = vrot.slane %v4062_v40, %v3926_v35  ;;  %v776_v62 = vrot.slane %v4062_v40, %v3929_v37 }
  0xf0   :  { %v4166_v43 = vpop.eup %3554  ;;  %v393_v47 = vadd.f32 1.0, %v3553_v2  ;;  %v1908_v58 = vcombine.low %v1886_v27, %v1893_v29  ;;  %3564 = vpow2.f32 %v3453_v20  ;;  %v780_v53 = vrot.slane %v4062_v40, %v3933_v44 }
  0xf1   :  { %3566 = vrcp.f32 %v409_v39  ;;  %v1909_v54 = vcombine.low %v1900_v32, %v1907_v41  ;;  %v784_v55 = vrot.slane %v4062_v40, %v3936_v45  ;;  %v788_v56 = vrot.slane %v4062_v40, %v3939_v46 }
  0xf2   :  { %3568 = vrcp.f32 %v393_v47  ;;  %v1916_v63 = vrot.slane %v1908_v58, %v3949_v52  ;;  %v792_v0 = vrot.slane %v4062_v40, %v3943_v49  ;;  %v796_v38 = vrot.slane %v4062_v40, %v3946_v51 }
  0xf3   :  { %v1923_v1 = vrot.slane %v1909_v54, %v3949_v52  ;;  %3570 = vpow2.f32 %v3437_v33  ;;  %v1925_v3 = vcombine.low %v768_v14, %v772_v42  ;;  %v1926_v4 = vcombine.low %v776_v62, %v780_v53 }
  0xf4   :  { %v1927_v8 = vcombine.low %v784_v55, %v788_v56  ;;  %v1928_v5 = vcombine.low %v792_v0, %v796_v38  ;;  %v284_v10 = vadd.f32 %v3902_v36, %v250_v59  ;;  %v268_v12 = vadd.f32 %v3902_v36, %v202_v60 }
  0xf5   :  { %v3557_v13 = vpop.eup %3556  ;;  %v1924_v16 = vcombine.low %v1916_v63, %v1923_v1  ;;  %v1935_v18 = vrot.slane %v1925_v3, %v3949_v52  ;;  %v1942_v19 = vrot.slane %v1926_v4, %v3949_v52  ;;  %v800_v40 = vrot.slane %v4076_v7, %v3922_v30 }
  0xf6   :  { %v3559_v21 = vpop.eup %3558  ;;  %v410_v23 = vadd.f32 1.0, %v3557_v13  ;;  %v1949_v25 = vrot.slane %v1927_v8, %v3949_v52  ;;  %v1956_v26 = vrot.slane %v1928_v5, %v3949_v52  ;;  %v3454_v27 = vmul.f32 -1.442695, %v284_v10 }
  0xf7   :  { %v4188_v14 = vpop.eup %3560  ;;  %v394_v28 = vadd.f32 1.0, %v3559_v21  ;;  %3123 = vperm.xlu1 %3459, %v1924_v16   ;;  %v1957_v36 = vcombine.low %v1935_v18, %v1942_v19  ;;  %v3438_v29 = vmul.f32 -1.442695, %v268_v12  ;;  %v804_v32 = vrot.slane %v4076_v7, %v3926_v35 }
  0xf8   :  { %v4192_v20 = vpop.eup %3562  ;;  %3572 = vrcp.f32 %v410_v23  ;;  %v1958_v33 = vcombine.low %v1949_v25, %v1956_v26  ;;  %v808_v2 = vrot.slane %v4076_v7, %v3929_v37  ;;  %v812_v39 = vrot.slane %v4076_v7, %v3933_v44 }
  0xf9   :  { %3574 = vrcp.f32 %v394_v28  ;;  %v1965_v41 = vrot.slane %v1957_v36, %v3949_v52  ;;  %v816_v42 = vrot.slane %v4076_v7, %v3936_v45  ;;  %v820_v62 = vrot.slane %v4076_v7, %v3939_v46 }
  0xfa   :  { %v1972_v47 = vrot.slane %v1958_v33, %v3949_v52  ;;  %3576 = vpow2.f32 %v3454_v27  ;;  %v824_v58 = vrot.slane %v4076_v7, %v3943_v49  ;;  %v828_v53 = vrot.slane %v4076_v7, %v3946_v51 }
  0xfb   :  { %3578 = vpow2.f32 %v3438_v29  ;;  %v1974_v54 = vcombine.low %v800_v40, %v804_v32  ;;  %v1975_v55 = vcombine.low %v808_v2, %v812_v39  ;;  %v1976_v56 = vcombine.low %v816_v42, %v820_v62 }
  0xfc   :  { %v1973_v59 = vcombine.low %v1965_v41, %v1972_v47  ;;  %v1977_v60 = vcombine.low %v824_v58, %v828_v53  ;;  %v1024_v63 = vrot.slane %v3968_v24, %v3922_v30  ;;  %v1028_v0 = vrot.slane %v3968_v24, %v3926_v35 }
  0xfd   :  { %v3565_v38 = vpop.eup %3564  ;;  %v1984_v1 = vrot.slane %v1974_v54, %v3949_v52  ;;  %v1991_v3 = vrot.slane %v1975_v55, %v3949_v52  ;;  %v1998_v4 = vrot.slane %v1976_v56, %v3949_v52  ;;  %v1032_v7 = vrot.slane %v3968_v24, %v3929_v37 }
  0xfe   :  { %v4217_v8 = vpop.eup %3566  ;;  %v411_v5 = vadd.f32 1.0, %v3565_v38  ;;  %3126 = vperm.xlu1 %3459, %v1973_v59   ;;  %v2005_v10 = vrot.slane %v1977_v60, %v3949_v52  ;;  %v1036_v12 = vrot.slane %v3968_v24, %v3933_v44  ;;  %v1040_v13 = vrot.slane %v3968_v24, %v3936_v45 }
  0xff   :  { %v4224_v16 = vpop.eup %3568  ;;  %v2006_v18 = vcombine.low %v1984_v1, %v1991_v3  ;;  %v1044_v19 = vrot.slane %v3968_v24, %v3939_v46  ;;  %v1048_v40 = vrot.slane %v3968_v24, %v3943_v49  ;;  %v1052_v21 = vrot.slane %v3968_v24, %v3946_v51 }
 0x100   :  { %v3571_v23 = vpop.eup %3570  ;;  %3580 = vrcp.f32 %v411_v5  ;;  %v2007_v25 = vcombine.low %v1998_v4, %v2005_v10  ;;  %v2317_v26 = vcombine.low %v1024_v63, %v1028_v0  ;;  %v2318_v27 = vcombine.low %v1032_v7, %v1036_v12 }
 0x101   :  { %v395_v28 = vadd.f32 1.0, %v3571_v23  ;;  %v2014_v36 = vrot.slane %v2006_v18, %v3949_v52  ;;  %v2319_v29 = vcombine.low %v1040_v13, %v1044_v19  ;;  %v2320_v32 = vcombine.low %v1048_v40, %v1052_v21 }
 0x102   :  { %v2021_v33 = vrot.slane %v2007_v25, %v3949_v52  ;;  %v2327_v2 = vrot.slane %v2317_v26, %v3949_v52  ;;  %v2334_v39 = vrot.slane %v2318_v27, %v3949_v52  ;;  %v832_v41 = vrot.slane %v4094_v31, %v3922_v30 }
 0x103   :  { %3582 = vrcp.f32 %v395_v28  ;;  %v2341_v24 = vrot.slane %v2319_v29, %v3949_v52  ;;  %v2348_v42 = vrot.slane %v2320_v32, %v3949_v52  ;;  %v836_v62 = vrot.slane %v4094_v31, %v3926_v35 }
 0x104   :  { %v2022_v47 = vcombine.low %v2014_v36, %v2021_v33  ;;  %v2349_v58 = vcombine.low %v2327_v2, %v2334_v39  ;;  %v840_v53 = vrot.slane %v4094_v31, %v3929_v37  ;;  %v844_v54 = vrot.slane %v4094_v31, %v3933_v44 }
 0x105   :  { %v4246_v55 = vpop.eup %3572  ;;  %v2350_v56 = vcombine.low %v2341_v24, %v2348_v42  ;;  %v848_v59 = vrot.slane %v4094_v31, %v3936_v45  ;;  %v852_v60 = vrot.slane %v4094_v31, %v3939_v46  ;;  %v856_v63 = vrot.slane %v4094_v31, %v3943_v49 }
 0x106   :  { %v4254_v0 = vpop.eup %3574  ;;  %3129 = vperm.xlu0 %3458, %v2022_v47   ;;  %v2357_v38 = vrot.slane %v2349_v58, %v3949_v52  ;;  %v860_v1 = vrot.slane %v4094_v31, %v3946_v51  ;;  %v2023_v3 = vcombine.low %v832_v41, %v836_v62  ;;  %v2024_v4 = vcombine.low %v840_v53, %v844_v54 }
 0x107   :  { %v3577_v7 = vpop.eup %3576  ;;  %v2364_v5 = vrot.slane %v2350_v56, %v3949_v52  ;;  %v2025_v10 = vcombine.low %v848_v59, %v852_v60  ;;  %v1088_v12 = vrot.slane %v3980_v48, %v3922_v30  ;;  %v1092_v13 = vrot.slane %v3980_v48, %v3926_v35 }
 0x108   :  { %v3579_v18 = vpop.eup %3578  ;;  %v412_v19 = vadd.f32 1.0, %v3577_v7  ;;  %v2026_v40 = vcombine.low %v856_v63, %v860_v1  ;;  %v2033_v21 = vrot.slane %v2023_v3, %v3949_v52  ;;  %v2040_v23 = vrot.slane %v2024_v4, %v3949_v52 }
 0x109   :  { %v396_v31 = vadd.f32 1.0, %v3579_v18  ;;  %v2365_v25 = vcombine.low %v2357_v38, %v2364_v5  ;;  %v2047_v26 = vrot.slane %v2025_v10, %v3949_v52  ;;  %v1096_v27 = vrot.slane %v3980_v48, %v3929_v37 }
 0x10a   :  { %3584 = vrcp.f32 %v412_v19  ;;  %v2054_v28 = vrot.slane %v2026_v40, %v3949_v52  ;;  %v2055_v36 = vcombine.low %v2033_v21, %v2040_v23  ;;  %v1100_v29 = vrot.slane %v3980_v48, %v3933_v44 }
 0x10b   :  { %3586 = vrcp.f32 %v396_v31  ;;  %3150 = vperm.xlu0 %3458, %v2365_v25   ;;  %v1104_v32 = vrot.slane %v3980_v48, %v3936_v45  ;;  %v1108_v33 = vrot.slane %v3980_v48, %v3939_v46  ;;  %v1112_v2 = vrot.slane %v3980_v48, %v3943_v49 }
 0x10c   :  { %v2056_v39 = vcombine.low %v2047_v26, %v2054_v28  ;;  %v2063_v41 = vrot.slane %v2055_v36, %v3949_v52  ;;  %v1116_v24 = vrot.slane %v3980_v48, %v3946_v51  ;;  %v2415_v42 = vcombine.low %v1088_v12, %v1092_v13 }
 0x10d   :  { %v4281_v62 = vpop.eup %3580  ;;  %v2416_v47 = vcombine.low %v1096_v27, %v1100_v29  ;;  %v2417_v58 = vcombine.low %v1104_v32, %v1108_v33  ;;  %v1056_v53 = vrot.slane %v3974_v34, %v3922_v30  ;;  %v1060_v54 = vrot.slane %v3974_v34, %v3926_v35 }
 0x10e   :  { %v2070_v56 = vrot.slane %v2056_v39, %v3949_v52  ;;  %v2418_v59 = vcombine.low %v1112_v2, %v1116_v24  ;;  %v2425_v60 = vrot.slane %v2415_v42, %v3949_v52  ;;  %v1064_v63 = vrot.slane %v3974_v34, %v3929_v37 }
 0x10f   :  { %v2432_v48 = vrot.slane %v2416_v47, %v3949_v52  ;;  %v2439_v38 = vrot.slane %v2417_v58, %v3949_v52  ;;  %v1068_v1 = vrot.slane %v3974_v34, %v3933_v44  ;;  %v1072_v3 = vrot.slane %v3974_v34, %v3936_v45 }
 0x110   :  { %v4297_v4 = vpop.eup %3582  ;;  %v2071_v7 = vcombine.low %v2063_v41, %v2070_v56  ;;  %v2446_v5 = vrot.slane %v2418_v59, %v3949_v52  ;;  %v1076_v10 = vrot.slane %v3974_v34, %v3939_v46  ;;  %v1080_v12 = vrot.slane %v3974_v34, %v3943_v49 }
 0x111   :  { %v2447_v13 = vcombine.low %v2425_v60, %v2432_v48  ;;  %v1084_v18 = vrot.slane %v3974_v34, %v3946_v51  ;;  %v2366_v19 = vcombine.low %v1056_v53, %v1060_v54  ;;  %v2367_v40 = vcombine.low %v1064_v63, %v1068_v1 }
 0x112   :  { %3132 = vperm.xlu1 %3459, %v2071_v7   ;;  %v2448_v21 = vcombine.low %v2439_v38, %v2446_v5  ;;  %v2368_v23 = vcombine.low %v1072_v3, %v1076_v10  ;;  %v1152_v31 = vrot.slane %v4006_v22, %v3922_v30  ;;  %v1156_v25 = vrot.slane %v4006_v22, %v3926_v35 }
 0x113   :  { %v2455_v26 = vrot.slane %v2447_v13, %v3949_v52  ;;  %v2369_v27 = vcombine.low %v1080_v12, %v1084_v18  ;;  %v2376_v28 = vrot.slane %v2366_v19, %v3949_v52  ;;  %v2383_v36 = vrot.slane %v2367_v40, %v3949_v52 }
 0x114   :  { %v2462_v34 = vrot.slane %v2448_v21, %v3949_v52  ;;  %v2390_v29 = vrot.slane %v2368_v23, %v3949_v52  ;;  %v1160_v32 = vrot.slane %v4006_v22, %v3929_v37  ;;  %v1164_v33 = vrot.slane %v4006_v22, %v3933_v44 }
 0x115   :  { %v2397_v2 = vrot.slane %v2369_v27, %v3949_v52  ;;  %v2398_v39 = vcombine.low %v2376_v28, %v2383_v36  ;;  %v1168_v41 = vrot.slane %v4006_v22, %v3936_v45  ;;  %v1172_v24 = vrot.slane %v4006_v22, %v3939_v46 }
 0x116   :  { %v2463_v42 = vcombine.low %v2455_v26, %v2462_v34  ;;  %v1176_v47 = vrot.slane %v4006_v22, %v3943_v49  ;;  %v1180_v58 = vrot.slane %v4006_v22, %v3946_v51  ;;  %v2513_v53 = vcombine.low %v1152_v31, %v1156_v25 }
 0x117   :  { %v4328_v54 = vpop.eup %3584  ;;  %v2399_v56 = vcombine.low %v2390_v29, %v2397_v2  ;;  %v2406_v59 = vrot.slane %v2398_v39, %v3949_v52  ;;  %v2514_v60 = vcombine.low %v1160_v32, %v1164_v33  ;;  %v2515_v63 = vcombine.low %v1168_v41, %v1172_v24 }
 0x118   :  { %v4331_v48 = vpop.eup %3586  ;;  %3156 = vperm.xlu0 %3458, %v2463_v42   ;;  %v2516_v38 = vcombine.low %v1176_v47, %v1180_v58  ;;  %v2523_v1 = vrot.slane %v2513_v53, %v3949_v52  ;;  %v1120_v3 = vrot.slane %v3985_v61, %v3922_v30  ;;  %v1124_v22 = vrot.slane %v3985_v61, %v3926_v35 }
 0x119   :  { %v2413_v7 = vrot.slane %v2399_v56, %v3949_v52  ;;  %v2530_v5 = vrot.slane %v2514_v60, %v3949_v52  ;;  %v2537_v10 = vrot.slane %v2515_v63, %v3949_v52  ;;  %v1128_v12 = vrot.slane %v3985_v61, %v3929_v37 }
 0x11a   :  { %v2544_v13 = vrot.slane %v2516_v38, %v3949_v52  ;;  %v1132_v18 = vrot.slane %v3985_v61, %v3933_v44  ;;  %v1136_v19 = vrot.slane %v3985_v61, %v3936_v45  ;;  %v1140_v40 = vrot.slane %v3985_v61, %v3939_v46 }
 0x11b   :  { %v2414_v21 = vcombine.low %v2406_v59, %v2413_v7  ;;  %v2545_v23 = vcombine.low %v2523_v1, %v2530_v5  ;;  %v1144_v31 = vrot.slane %v3985_v61, %v3943_v49  ;;  %v1148_v25 = vrot.slane %v3985_v61, %v3946_v51 }
 0x11c   :  { %v2546_v26 = vcombine.low %v2537_v10, %v2544_v13  ;;  %v2464_v27 = vcombine.low %v1120_v3, %v1124_v22  ;;  %v2465_v28 = vcombine.low %v1128_v12, %v1132_v18  ;;  %v2466_v36 = vcombine.low %v1136_v19, %v1140_v40 }
 0x11d   :  { %3153 = vperm.xlu1 %3459, %v2414_v21   ;;  %v2553_v34 = vrot.slane %v2545_v23, %v3949_v52  ;;  %v2467_v29 = vcombine.low %v1144_v31, %v1148_v25  ;;  %v1216_v32 = vrot.slane %v4038_v9, %v3922_v30  ;;  %v1220_v33 = vrot.slane %v4038_v9, %v3926_v35 }
 0x11e   :  { %v2560_v2 = vrot.slane %v2546_v26, %v3949_v52  ;;  %v2474_v39 = vrot.slane %v2464_v27, %v3949_v52  ;;  %v2481_v61 = vrot.slane %v2465_v28, %v3949_v52  ;;  %v2488_v41 = vrot.slane %v2466_v36, %v3949_v52 }
 0x11f   :  { %v2495_v24 = vrot.slane %v2467_v29, %v3949_v52  ;;  %v1224_v42 = vrot.slane %v4038_v9, %v3929_v37  ;;  %v1228_v47 = vrot.slane %v4038_v9, %v3933_v44  ;;  %v1232_v58 = vrot.slane %v4038_v9, %v3936_v45 }
 0x120   :  { %v2561_v53 = vcombine.low %v2553_v34, %v2560_v2  ;;  %v2496_v56 = vcombine.low %v2474_v39, %v2481_v61  ;;  %v1236_v59 = vrot.slane %v4038_v9, %v3939_v46  ;;  %v1240_v60 = vrot.slane %v4038_v9, %v3943_v49 }
 0x121   :  { %v2497_v63 = vcombine.low %v2488_v41, %v2495_v24  ;;  %v1244_v38 = vrot.slane %v4038_v9, %v3946_v51  ;;  %v2611_v1 = vcombine.low %v1216_v32, %v1220_v33  ;;  %v2612_v3 = vcombine.low %v1224_v42, %v1228_v47 }
 0x122   :  { %3162 = vperm.xlu0 %3458, %v2561_v53   ;;  %v2504_v22 = vrot.slane %v2496_v56, %v3949_v52  ;;  %v2613_v7 = vcombine.low %v1232_v58, %v1236_v59  ;;  %v1184_v5 = vrot.slane %v4019_v50, %v3922_v30  ;;  %v1188_v10 = vrot.slane %v4019_v50, %v3926_v35 }
 0x123   :  { %v2511_v12 = vrot.slane %v2497_v63, %v3949_v52  ;;  %v2614_v13 = vcombine.low %v1240_v60, %v1244_v38  ;;  %v2621_v18 = vrot.slane %v2611_v1, %v3949_v52  ;;  %v2628_v19 = vrot.slane %v2612_v3, %v3949_v52 }
 0x124   :  { %v2635_v9 = vrot.slane %v2613_v7, %v3949_v52  ;;  %v1192_v40 = vrot.slane %v4019_v50, %v3929_v37  ;;  %v1196_v21 = vrot.slane %v4019_v50, %v3933_v44  ;;  %v1200_v23 = vrot.slane %v4019_v50, %v3936_v45 }
 0x125   :  { %v2512_v31 = vcombine.low %v2504_v22, %v2511_v12  ;;  %v2642_v25 = vrot.slane %v2614_v13, %v3949_v52  ;;  %v2643_v26 = vcombine.low %v2621_v18, %v2628_v19  ;;  %v1204_v27 = vrot.slane %v4019_v50, %v3939_v46 }
 0x126   :  { %v1208_v28 = vrot.slane %v4019_v50, %v3943_v49  ;;  %v1212_v36 = vrot.slane %v4019_v50, %v3946_v51  ;;  %v2562_v34 = vcombine.low %v1184_v5, %v1188_v10  ;;  %v2563_v29 = vcombine.low %v1192_v40, %v1196_v21 }
 0x127   :  { %3159 = vperm.xlu1 %3459, %v2512_v31   ;;  %v2644_v32 = vcombine.low %v2635_v9, %v2642_v25  ;;  %v2651_v33 = vrot.slane %v2643_v26, %v3949_v52  ;;  %v2564_v2 = vcombine.low %v1200_v23, %v1204_v27  ;;  %v1280_v39 = vrot.slane %v4118_v15, %v3922_v30 }
 0x128   :  { %v2565_v61 = vcombine.low %v1208_v28, %v1212_v36  ;;  %v2572_v41 = vrot.slane %v2562_v34, %v3949_v52  ;;  %v2579_v24 = vrot.slane %v2563_v29, %v3949_v52  ;;  %v1284_v42 = vrot.slane %v4118_v15, %v3926_v35 }
 0x129   :  { %v2658_v50 = vrot.slane %v2644_v32, %v3949_v52  ;;  %v2586_v47 = vrot.slane %v2564_v2, %v3949_v52  ;;  %v1288_v58 = vrot.slane %v4118_v15, %v3929_v37  ;;  %v1292_v53 = vrot.slane %v4118_v15, %v3933_v44 }
 0x12a   :  { %v2593_v56 = vrot.slane %v2565_v61, %v3949_v52  ;;  %v2594_v59 = vcombine.low %v2572_v41, %v2579_v24  ;;  %v1296_v60 = vrot.slane %v4118_v15, %v3936_v45  ;;  %v1300_v63 = vrot.slane %v4118_v15, %v3939_v46 }
 0x12b   :  { %v2659_v38 = vcombine.low %v2651_v33, %v2658_v50  ;;  %v1304_v1 = vrot.slane %v4118_v15, %v3943_v49  ;;  %v1308_v3 = vrot.slane %v4118_v15, %v3946_v51  ;;  %v2709_v22 = vcombine.low %v1280_v39, %v1284_v42 }
 0x12c   :  { %v2595_v7 = vcombine.low %v2586_v47, %v2593_v56  ;;  %v2602_v5 = vrot.slane %v2594_v59, %v3949_v52  ;;  %v2710_v10 = vcombine.low %v1288_v58, %v1292_v53  ;;  %v2711_v12 = vcombine.low %v1296_v60, %v1300_v63 }
 0x12d   :  { %3168 = vperm.xlu0 %3458, %v2659_v38   ;;  %v2712_v13 = vcombine.low %v1304_v1, %v1308_v3  ;;  %v2719_v18 = vrot.slane %v2709_v22, %v3949_v52  ;;  %v1248_v19 = vrot.slane %v4070_v57, %v3922_v30  ;;  %v1252_v9 = vrot.slane %v4070_v57, %v3926_v35 }
 0x12e   :  { %v2609_v40 = vrot.slane %v2595_v7, %v3949_v52  ;;  %v2726_v15 = vrot.slane %v2710_v10, %v3949_v52  ;;  %v2733_v21 = vrot.slane %v2711_v12, %v3949_v52  ;;  %v1256_v23 = vrot.slane %v4070_v57, %v3929_v37 }
 0x12f   :  { %v2740_v31 = vrot.slane %v2712_v13, %v3949_v52  ;;  %v1260_v25 = vrot.slane %v4070_v57, %v3933_v44  ;;  %v1264_v26 = vrot.slane %v4070_v57, %v3936_v45  ;;  %v1268_v27 = vrot.slane %v4070_v57, %v3939_v46 }
 0x130   :  { %v2610_v28 = vcombine.low %v2602_v5, %v2609_v40  ;;  %v2741_v36 = vcombine.low %v2719_v18, %v2726_v15  ;;  %v1272_v34 = vrot.slane %v4070_v57, %v3943_v49  ;;  %v1276_v29 = vrot.slane %v4070_v57, %v3946_v51 }
 0x131   :  { %v2742_v32 = vcombine.low %v2733_v21, %v2740_v31  ;;  %v2660_v33 = vcombine.low %v1248_v19, %v1252_v9  ;;  %v2661_v2 = vcombine.low %v1256_v23, %v1260_v25  ;;  %v2662_v39 = vcombine.low %v1264_v26, %v1268_v27 }
 0x132   :  { %3165 = vperm.xlu1 %3459, %v2610_v28   ;;  %v2749_v61 = vrot.slane %v2741_v36, %v3949_v52  ;;  %v2663_v41 = vcombine.low %v1272_v34, %v1276_v29  ;;  %v1344_v24 = vrot.slane %v4166_v43, %v3922_v30  ;;  %v1348_v42 = vrot.slane %v4166_v43, %v3926_v35 }
 0x133   :  { %v2756_v50 = vrot.slane %v2742_v32, %v3949_v52  ;;  %v2670_v47 = vrot.slane %v2660_v33, %v3949_v52  ;;  %v2677_v57 = vrot.slane %v2661_v2, %v3949_v52  ;;  %v2684_v58 = vrot.slane %v2662_v39, %v3949_v52 }
 0x134   :  { %v2691_v53 = vrot.slane %v2663_v41, %v3949_v52  ;;  %v1352_v56 = vrot.slane %v4166_v43, %v3929_v37  ;;  %v1356_v59 = vrot.slane %v4166_v43, %v3933_v44  ;;  %v1360_v60 = vrot.slane %v4166_v43, %v3936_v45 }
 0x135   :  { %v2757_v63 = vcombine.low %v2749_v61, %v2756_v50  ;;  %v2692_v38 = vcombine.low %v2670_v47, %v2677_v57  ;;  %v1364_v1 = vrot.slane %v4166_v43, %v3939_v46  ;;  %v1368_v3 = vrot.slane %v4166_v43, %v3943_v49 }
 0x136   :  { %v2693_v22 = vcombine.low %v2684_v58, %v2691_v53  ;;  %v1372_v7 = vrot.slane %v4166_v43, %v3946_v51  ;;  %v2807_v5 = vcombine.low %v1344_v24, %v1348_v42  ;;  %v2808_v10 = vcombine.low %v1352_v56, %v1356_v59 }
 0x137   :  { %3174 = vperm.xlu0 %3458, %v2757_v63   ;;  %v2700_v12 = vrot.slane %v2692_v38, %v3949_v52  ;;  %v2809_v13 = vcombine.low %v1360_v60, %v1364_v1  ;;  %v1312_v18 = vrot.slane %v4144_v11, %v3922_v30  ;;  %v1316_v19 = vrot.slane %v4144_v11, %v3926_v35 }
 0x138   :  { %v2707_v9 = vrot.slane %v2693_v22, %v3949_v52  ;;  %v2810_v40 = vcombine.low %v1368_v3, %v1372_v7  ;;  %v2817_v15 = vrot.slane %v2807_v5, %v3949_v52  ;;  %v2824_v21 = vrot.slane %v2808_v10, %v3949_v52 }
 0x139   :  { %v2831_v43 = vrot.slane %v2809_v13, %v3949_v52  ;;  %v1320_v23 = vrot.slane %v4144_v11, %v3929_v37  ;;  %v1324_v31 = vrot.slane %v4144_v11, %v3933_v44  ;;  %v1328_v25 = vrot.slane %v4144_v11, %v3936_v45 }
 0x13a   :  { %v2708_v26 = vcombine.low %v2700_v12, %v2707_v9  ;;  %v2838_v27 = vrot.slane %v2810_v40, %v3949_v52  ;;  %v2839_v28 = vcombine.low %v2817_v15, %v2824_v21  ;;  %v1332_v36 = vrot.slane %v4144_v11, %v3939_v46 }
 0x13b   :  { %v1336_v34 = vrot.slane %v4144_v11, %v3943_v49  ;;  %v1340_v29 = vrot.slane %v4144_v11, %v3946_v51  ;;  %v2758_v32 = vcombine.low %v1312_v18, %v1316_v19  ;;  %v2759_v33 = vcombine.low %v1320_v23, %v1324_v31 }
 0x13c   :  { %3171 = vperm.xlu1 %3459, %v2708_v26   ;;  %v2840_v2 = vcombine.low %v2831_v43, %v2838_v27  ;;  %v2847_v39 = vrot.slane %v2839_v28, %v3949_v52  ;;  %v2760_v61 = vcombine.low %v1328_v25, %v1332_v36  ;;  %v1376_v41 = vrot.slane %v4188_v14, %v3922_v30 }
 0x13d   :  { %v2761_v24 = vcombine.low %v1336_v34, %v1340_v29  ;;  %v2768_v42 = vrot.slane %v2758_v32, %v3949_v52  ;;  %v2775_v50 = vrot.slane %v2759_v33, %v3949_v52  ;;  %v1380_v47 = vrot.slane %v4188_v14, %v3926_v35 }
 0x13e   :  { %v2854_v11 = vrot.slane %v2840_v2, %v3949_v52  ;;  %v2782_v57 = vrot.slane %v2760_v61, %v3949_v52  ;;  %v1384_v58 = vrot.slane %v4188_v14, %v3929_v37  ;;  %v1388_v53 = vrot.slane %v4188_v14, %v3933_v44 }
 0x13f   :  { %v2789_v56 = vrot.slane %v2761_v24, %v3949_v52  ;;  %v2790_v59 = vcombine.low %v2768_v42, %v2775_v50  ;;  %v1392_v60 = vrot.slane %v4188_v14, %v3936_v45  ;;  %v1396_v63 = vrot.slane %v4188_v14, %v3939_v46 }
 0x140   :  { %v2855_v38 = vcombine.low %v2847_v39, %v2854_v11  ;;  %v1400_v1 = vrot.slane %v4188_v14, %v3943_v49  ;;  %v1404_v3 = vrot.slane %v4188_v14, %v3946_v51  ;;  %v2856_v22 = vcombine.low %v1376_v41, %v1380_v47 }
 0x141   :  { %v2791_v7 = vcombine.low %v2782_v57, %v2789_v56  ;;  %v2798_v5 = vrot.slane %v2790_v59, %v3949_v52  ;;  %v2857_v10 = vcombine.low %v1384_v58, %v1388_v53  ;;  %v2858_v12 = vcombine.low %v1392_v60, %v1396_v63 }
 0x142   :  { %3180 = vperm.xlu0 %3458, %v2855_v38   ;;  %v2859_v13 = vcombine.low %v1400_v1, %v1404_v3  ;;  %v2866_v18 = vrot.slane %v2856_v22, %v3949_v52  ;;  %v864_v19 = vrot.slane %v4192_v20, %v3922_v30  ;;  %v868_v9 = vrot.slane %v4192_v20, %v3926_v35 }
 0x143   :  { %v2805_v40 = vrot.slane %v2791_v7, %v3949_v52  ;;  %v2873_v14 = vrot.slane %v2857_v10, %v3949_v52  ;;  %v2880_v15 = vrot.slane %v2858_v12, %v3949_v52  ;;  %v872_v21 = vrot.slane %v4192_v20, %v3929_v37 }
 0x144   :  { %v2887_v43 = vrot.slane %v2859_v13, %v3949_v52  ;;  %v876_v23 = vrot.slane %v4192_v20, %v3933_v44  ;;  %v880_v31 = vrot.slane %v4192_v20, %v3936_v45  ;;  %v884_v25 = vrot.slane %v4192_v20, %v3939_v46 }
 0x145   :  { %v2806_v26 = vcombine.low %v2798_v5, %v2805_v40  ;;  %v2888_v27 = vcombine.low %v2866_v18, %v2873_v14  ;;  %v888_v28 = vrot.slane %v4192_v20, %v3943_v49  ;;  %v892_v36 = vrot.slane %v4192_v20, %v3946_v51 }
 0x146   :  { %v2889_v34 = vcombine.low %v2880_v15, %v2887_v43  ;;  %v2072_v29 = vcombine.low %v864_v19, %v868_v9  ;;  %v2073_v32 = vcombine.low %v872_v21, %v876_v23  ;;  %v2074_v33 = vcombine.low %v880_v31, %v884_v25 }
 0x147   :  { %3177 = vperm.xlu1 %3459, %v2806_v26   ;;  %v2896_v2 = vrot.slane %v2888_v27, %v3949_v52  ;;  %v2075_v39 = vcombine.low %v888_v28, %v892_v36  ;;  %v1408_v61 = vrot.slane %v4217_v8, %v3922_v30  ;;  %v1412_v41 = vrot.slane %v4217_v8, %v3926_v35 }
 0x148   :  { %v2903_v24 = vrot.slane %v2889_v34, %v3949_v52  ;;  %v2082_v42 = vrot.slane %v2072_v29, %v3949_v52  ;;  %v2089_v20 = vrot.slane %v2073_v32, %v3949_v52  ;;  %v2096_v50 = vrot.slane %v2074_v33, %v3949_v52 }
 0x149   :  { %v2103_v47 = vrot.slane %v2075_v39, %v3949_v52  ;;  %v1416_v11 = vrot.slane %v4217_v8, %v3929_v37  ;;  %v1420_v57 = vrot.slane %v4217_v8, %v3933_v44  ;;  %v1424_v58 = vrot.slane %v4217_v8, %v3936_v45 }
 0x14a   :  { %v2904_v53 = vcombine.low %v2896_v2, %v2903_v24  ;;  %v2104_v56 = vcombine.low %v2082_v42, %v2089_v20  ;;  %v1428_v59 = vrot.slane %v4217_v8, %v3939_v46  ;;  %v1432_v60 = vrot.slane %v4217_v8, %v3943_v49 }
 0x14b   :  { %v2105_v63 = vcombine.low %v2096_v50, %v2103_v47  ;;  %v1436_v38 = vrot.slane %v4217_v8, %v3946_v51  ;;  %v2905_v1 = vcombine.low %v1408_v61, %v1412_v41  ;;  %v2906_v3 = vcombine.low %v1416_v11, %v1420_v57 }
 0x14c   :  { %3183 = vperm.xlu0 %3458, %v2904_v53   ;;  %v2112_v22 = vrot.slane %v2104_v56, %v3949_v52  ;;  %v2907_v7 = vcombine.low %v1424_v58, %v1428_v59  ;;  %v896_v5 = vrot.slane %v4224_v16, %v3922_v30  ;;  %v900_v10 = vrot.slane %v4224_v16, %v3926_v35 }
 0x14d   :  { %v2119_v12 = vrot.slane %v2105_v63, %v3949_v52  ;;  %v2908_v13 = vcombine.low %v1432_v60, %v1436_v38  ;;  %v2915_v18 = vrot.slane %v2905_v1, %v3949_v52  ;;  %v2922_v19 = vrot.slane %v2906_v3, %v3949_v52 }
 0x14e   :  { %v2929_v8 = vrot.slane %v2907_v7, %v3949_v52  ;;  %v904_v9 = vrot.slane %v4224_v16, %v3929_v37  ;;  %v908_v40 = vrot.slane %v4224_v16, %v3933_v44  ;;  %v912_v14 = vrot.slane %v4224_v16, %v3936_v45 }
 0x14f   :  { %v2120_v15 = vcombine.low %v2112_v22, %v2119_v12  ;;  %v2936_v21 = vrot.slane %v2908_v13, %v3949_v52  ;;  %v2937_v43 = vcombine.low %v2915_v18, %v2922_v19  ;;  %v916_v23 = vrot.slane %v4224_v16, %v3939_v46 }
 0x150   :  { %v920_v31 = vrot.slane %v4224_v16, %v3943_v49  ;;  %v924_v25 = vrot.slane %v4224_v16, %v3946_v51  ;;  %v2121_v26 = vcombine.low %v896_v5, %v900_v10  ;;  %v2122_v27 = vcombine.low %v904_v9, %v908_v40 }
 0x151   :  { %3135 = vperm.xlu1 %3459, %v2120_v15   ;;  %v2938_v28 = vcombine.low %v2929_v8, %v2936_v21  ;;  %v2945_v36 = vrot.slane %v2937_v43, %v3949_v52  ;;  %v2123_v34 = vcombine.low %v912_v14, %v916_v23  ;;  %v1440_v29 = vrot.slane %v4246_v55, %v3922_v30 }
 0x152   :  { %v2124_v32 = vcombine.low %v920_v31, %v924_v25  ;;  %v2131_v33 = vrot.slane %v2121_v26, %v3949_v52  ;;  %v2138_v2 = vrot.slane %v2122_v27, %v3949_v52  ;;  %v1444_v39 = vrot.slane %v4246_v55, %v3926_v35 }
 0x153   :  { %v2952_v16 = vrot.slane %v2938_v28, %v3949_v52  ;;  %v2145_v61 = vrot.slane %v2123_v34, %v3949_v52  ;;  %v1448_v41 = vrot.slane %v4246_v55, %v3929_v37  ;;  %v1452_v24 = vrot.slane %v4246_v55, %v3933_v44 }
 0x154   :  { %v2152_v42 = vrot.slane %v2124_v32, %v3949_v52  ;;  %v2153_v20 = vcombine.low %v2131_v33, %v2138_v2  ;;  %v1456_v50 = vrot.slane %v4246_v55, %v3936_v45  ;;  %v1460_v47 = vrot.slane %v4246_v55, %v3939_v46 }
 0x155   :  { %v2953_v11 = vcombine.low %v2945_v36, %v2952_v16  ;;  %v1464_v57 = vrot.slane %v4246_v55, %v3943_v49  ;;  %v1468_v58 = vrot.slane %v4246_v55, %v3946_v51  ;;  %v2954_v53 = vcombine.low %v1440_v29, %v1444_v39 }
 0x156   :  { %v2154_v56 = vcombine.low %v2145_v61, %v2152_v42  ;;  %v2161_v59 = vrot.slane %v2153_v20, %v3949_v52  ;;  %v2955_v60 = vcombine.low %v1448_v41, %v1452_v24  ;;  %v2956_v63 = vcombine.low %v1456_v50, %v1460_v47 }
 0x157   :  { %3186 = vperm.xlu0 %3458, %v2953_v11   ;;  %v2957_v38 = vcombine.low %v1464_v57, %v1468_v58  ;;  %v2964_v1 = vrot.slane %v2954_v53, %v3949_v52  ;;  %v928_v3 = vrot.slane %v4254_v0, %v3922_v30  ;;  %v932_v22 = vrot.slane %v4254_v0, %v3926_v35 }
 0x158   :  { %v2168_v7 = vrot.slane %v2154_v56, %v3949_v52  ;;  %v2971_v55 = vrot.slane %v2955_v60, %v3949_v52  ;;  %v2978_v5 = vrot.slane %v2956_v63, %v3949_v52  ;;  %v936_v10 = vrot.slane %v4254_v0, %v3929_v37 }
 0x159   :  { %v2985_v12 = vrot.slane %v2957_v38, %v3949_v52  ;;  %v940_v13 = vrot.slane %v4254_v0, %v3933_v44  ;;  %v944_v18 = vrot.slane %v4254_v0, %v3936_v45  ;;  %v948_v19 = vrot.slane %v4254_v0, %v3939_v46 }
 0x15a   :  { %v2169_v8 = vcombine.low %v2161_v59, %v2168_v7  ;;  %v2986_v9 = vcombine.low %v2964_v1, %v2971_v55  ;;  %v952_v40 = vrot.slane %v4254_v0, %v3943_v49  ;;  %v956_v14 = vrot.slane %v4254_v0, %v3946_v51 }
 0x15b   :  { %v2987_v15 = vcombine.low %v2978_v5, %v2985_v12  ;;  %v2170_v21 = vcombine.low %v928_v3, %v932_v22  ;;  %v2171_v43 = vcombine.low %v936_v10, %v940_v13  ;;  %v2172_v23 = vcombine.low %v944_v18, %v948_v19 }
 0x15c   :  { %3138 = vperm.xlu1 %3459, %v2169_v8   ;;  %v2994_v31 = vrot.slane %v2986_v9, %v3949_v52  ;;  %v2173_v25 = vcombine.low %v952_v40, %v956_v14  ;;  %v1472_v26 = vrot.slane %v4281_v62, %v3922_v30  ;;  %v1476_v27 = vrot.slane %v4281_v62, %v3926_v35 }
 0x15d   :  { %v3001_v28 = vrot.slane %v2987_v15, %v3949_v52  ;;  %v2180_v36 = vrot.slane %v2170_v21, %v3949_v52  ;;  %v2187_v0 = vrot.slane %v2171_v43, %v3949_v52  ;;  %v2194_v34 = vrot.slane %v2172_v23, %v3949_v52 }
 0x15e   :  { %v2201_v29 = vrot.slane %v2173_v25, %v3949_v52  ;;  %v1480_v32 = vrot.slane %v4281_v62, %v3929_v37  ;;  %v1484_v33 = vrot.slane %v4281_v62, %v3933_v44  ;;  %v1488_v2 = vrot.slane %v4281_v62, %v3936_v45 }
 0x15f   :  { %v3002_v39 = vcombine.low %v2994_v31, %v3001_v28  ;;  %v2202_v16 = vcombine.low %v2180_v36, %v2187_v0  ;;  %v1492_v61 = vrot.slane %v4281_v62, %v3939_v46  ;;  %v1496_v41 = vrot.slane %v4281_v62, %v3943_v49 }
 0x160   :  { %v2203_v24 = vcombine.low %v2194_v34, %v2201_v29  ;;  %v1500_v42 = vrot.slane %v4281_v62, %v3946_v51  ;;  %v3003_v20 = vcombine.low %v1472_v26, %v1476_v27  ;;  %v3004_v50 = vcombine.low %v1480_v32, %v1484_v33 }
 0x161   :  { %3189 = vperm.xlu0 %3458, %v3002_v39   ;;  %v2210_v47 = vrot.slane %v2202_v16, %v3949_v52  ;;  %v3005_v11 = vcombine.low %v1488_v2, %v1492_v61  ;;  %v960_v57 = vrot.slane %v4297_v4, %v3922_v30  ;;  %v964_v58 = vrot.slane %v4297_v4, %v3926_v35 }
 0x162   :  { %v2217_v53 = vrot.slane %v2203_v24, %v3949_v52  ;;  %v3006_v56 = vcombine.low %v1496_v41, %v1500_v42  ;;  %v3013_v59 = vrot.slane %v3003_v20, %v3949_v52  ;;  %v3020_v60 = vrot.slane %v3004_v50, %v3949_v52 }
 0x163   :  { %v3027_v62 = vrot.slane %v3005_v11, %v3949_v52  ;;  %v968_v63 = vrot.slane %v4297_v4, %v3929_v37  ;;  %v972_v38 = vrot.slane %v4297_v4, %v3933_v44  ;;  %v976_v1 = vrot.slane %v4297_v4, %v3936_v45 }
 0x164   :  { %v2218_v3 = vcombine.low %v2210_v47, %v2217_v53  ;;  %v3034_v22 = vrot.slane %v3006_v56, %v3949_v52  ;;  %v3035_v7 = vcombine.low %v3013_v59, %v3020_v60  ;;  %v980_v55 = vrot.slane %v4297_v4, %v3939_v46 }
 0x165   :  { %v984_v5 = vrot.slane %v4297_v4, %v3943_v49  ;;  %v988_v10 = vrot.slane %v4297_v4, %v3946_v51  ;;  %v2219_v12 = vcombine.low %v960_v57, %v964_v58  ;;  %v2220_v13 = vcombine.low %v968_v63, %v972_v38 }
 0x166   :  { %3141 = vperm.xlu1 %3459, %v2218_v3   ;;  %v3036_v18 = vcombine.low %v3027_v62, %v3034_v22  ;;  %v3043_v19 = vrot.slane %v3035_v7, %v3949_v52  ;;  %v2221_v8 = vcombine.low %v976_v1, %v980_v55  ;;  %v1504_v9 = vrot.slane %v4328_v54, %v3922_v30 }
 0x167   :  { %v2222_v40 = vcombine.low %v984_v5, %v988_v10  ;;  %v2229_v14 = vrot.slane %v2219_v12, %v3949_v52  ;;  %v2236_v15 = vrot.slane %v2220_v13, %v3949_v52  ;;  %v1508_v21 = vrot.slane %v4328_v54, %v3926_v35  ;;  %v3106_v5 = vpop.permute.xlu1 %3105 }
 0x168   :  { %v3050_v4 = vrot.slane %v3036_v18, %v3949_v52  ;;  %v2243_v43 = vrot.slane %v2221_v8, %v3949_v52  ;;  %v1512_v23 = vrot.slane %v4328_v54, %v3929_v37  ;;  %v1516_v31 = vrot.slane %v4328_v54, %v3933_v44  ;;  %v3103_v8 = vpop.permute.xlu0 %3102 }
 0x169   :  { %v2250_v25 = vrot.slane %v2222_v40, %v3949_v52  ;;  %v2251_v26 = vcombine.low %v2229_v14, %v2236_v15  ;;  %v1520_v27 = vrot.slane %v4328_v54, %v3936_v45  ;;  %v1524_v28 = vrot.slane %v4328_v54, %v3939_v46 }
 0x16a   :  { %v3051_v36 = vcombine.low %v3043_v19, %v3050_v4  ;;  %v1528_v0 = vrot.slane %v4328_v54, %v3943_v49  ;;  %v1532_v34 = vrot.slane %v4328_v54, %v3946_v51  ;;  %v3052_v29 = vcombine.low %v1504_v9, %v1508_v21 }
 0x16b   :  { %v2252_v32 = vcombine.low %v2243_v43, %v2250_v25  ;;  %v2259_v33 = vrot.slane %v2251_v26, %v3949_v52  ;;  %v3053_v2 = vcombine.low %v1512_v23, %v1516_v31  ;;  %v3054_v39 = vcombine.low %v1520_v27, %v1524_v28  ;;  %v4714_v10 = vpop.permute.xlu1 %3108 }
 0x16c   :  { %3192 = vperm.xlu0 %3458, %v3051_v36   ;;  %v3055_v16 = vcombine.low %v1528_v0, %v1532_v34  ;;  %v3062_v61 = vrot.slane %v3052_v29, %v3949_v52  ;;  %v992_v41 = vrot.slane %v4331_v48, %v3922_v30  ;;  %v996_v24 = vrot.slane %v4331_v48, %v3926_v35 }
 0x16d   :  { %v2266_v42 = vrot.slane %v2252_v32, %v3949_v52  ;;  %v3069_v54 = vrot.slane %v3053_v2, %v3949_v52  ;;  %v3076_v20 = vrot.slane %v3054_v39, %v3949_v52  ;;  %v1000_v50 = vrot.slane %v4331_v48, %v3929_v37 }
 0x16e   :  { %v3083_v47 = vrot.slane %v3055_v16, %v3949_v52  ;;  %v1004_v11 = vrot.slane %v4331_v48, %v3933_v44  ;;  %v1008_v30 = vrot.slane %v4331_v48, %v3936_v45  ;;  %v1012_v35 = vrot.slane %v4331_v48, %v3939_v46 }
 0x16f   :  { %v2267_v57 = vcombine.low %v2259_v33, %v2266_v42  ;;  %v3084_v58 = vcombine.low %v3062_v61, %v3069_v54  ;;  %v1016_v53 = vrot.slane %v4331_v48, %v3943_v49  ;;  %v1020_v56 = vrot.slane %v4331_v48, %v3946_v51  ;;  %v4716_v12 = vpop.permute.xlu1 %3111 }
 0x170   :  { %v3085_v37 = vcombine.low %v3076_v20, %v3083_v47  ;;  %v2268_v59 = vcombine.low %v992_v41, %v996_v24  ;;  %v2269_v60 = vcombine.low %v1000_v50, %v1004_v11  ;;  %v2270_v62 = vcombine.low %v1008_v30, %v1012_v35 }
 0x171   :  { %3144 = vperm.xlu1 %3459, %v2267_v57   ;;  %v3092_v44 = vrot.slane %v3084_v58, %v3949_v52  ;;  %v2271_v63 = vcombine.low %v1016_v53, %v1020_v56  ;;  %v4739_v36 = vand.u32 127, %v509_v6 }
 0x172   :  { %v3099_v45 = vrot.slane %v3085_v37, %v3949_v52  ;;  %v2278_v46 = vrot.slane %v2268_v59, %v3949_v52  ;;  %v2285_v38 = vrot.slane %v2269_v60, %v3949_v52  ;;  %v2292_v1 = vrot.slane %v2270_v62, %v3949_v52 }
 0x173   :  { %v2299_v49 = vrot.slane %v2271_v63, %v3949_v52  ;;  %v4718_v13 = vpop.permute.xlu1 %3114  ;;  %v3203_v34 = vadd.s32 4294967288, %v4739_v36  ;;  %v3210_v29 = vadd.s32 4294967280, %v4739_v36  ;;  %v3217_v2 = vadd.s32 4294967272, %v4739_v36 }
 0x174   :  { %v3100_v3 = vcombine.low %v3092_v44, %v3099_v45  ;;  %v2300_v51 = vcombine.low %v2278_v46, %v2285_v38  ;;  %v3201_v16 = vsub.s32 %v4739_v36, %v3917_v17  ;;  %v3224_v61 = vadd.s32 4294967264, %v4739_v36 }
 0x175   :  { %v2301_v48 = vcombine.low %v2292_v1, %v2299_v49  ;;  %v3206_v33 = vsub.s32 %v3203_v34, %v3917_v17  ;;  %v3213_v24 = vsub.s32 %v3210_v29, %v3917_v17  ;;  %v3220_v42 = vsub.s32 %v3217_v2, %v3917_v17 }
 0x176   :  { %3195 = vperm.xlu0 %3458, %v3100_v3   ;;  %v2308_v22 = vrot.slane %v2300_v51, %v3949_v52  ;;  %v3231_v54 = vadd.s32 4294967256, %v4739_v36  ;;  %v3227_v11 = vsub.s32 %v3224_v61, %v3917_v17  ;;  %v3238_v53 = vadd.s32 4294967248, %v4739_v36 }
 0x177   :  { %v2315_v7 = vrot.slane %v2301_v48, %v3949_v52  ;;  %v4720_v18 = vpop.permute.xlu1 %3117  ;;  %v3207_v58 = vrot.slane %v3106_v5, %v3206_v33  ;;  %v3202_v56 = vrot.slane %v3103_v8, %v3201_v16  ;;  %v3214_v37 = vrot.slane %v4714_v10, %v3213_v24 }
 0x178   :  { %v3234_v59 = vsub.s32 %v3231_v54, %v3917_v17  ;;  %v3245_v60 = vadd.s32 4294967240, %v4739_v36  ;;  %v3221_v62 = vrot.slane %v4716_v12, %v3220_v42  ;;  %v3228_v45 = vrot.slane %v4718_v13, %v3227_v11 }
 0x179   :  { %v2316_v55 = vcombine.low %v2308_v22, %v2315_v7  ;;  %v3209_v1 = vsel %vm3208_vm1, %v3207_v58, %v3202_v56  ;;  %v3241_v49 = vsub.s32 %v3238_v53, %v3917_v17  ;;  %v3252_v3 = vadd.s32 4294967232, %v4739_v36 }
 0x17a   :  { %v3216_v48 = vsel %vm3215_vm2, %v3214_v37, %v3209_v1  ;;  %v3248_v22 = vsub.s32 %v3245_v60, %v3917_v17  ;;  %v3259_v7 = vadd.s32 4294967224, %v4739_v36  ;;  %v3287_v29 = vadd.s32 4294967192, %v4739_v36 }
 0x17b   :  { %3147 = vperm.xlu1 %3459, %v2316_v55   ;;  %v4722_v19 = vpop.permute.xlu1 %3120  ;;  %v3223_v5 = vsel %vm3222_vm3, %v3221_v62, %v3216_v48 }
 0x17c   :  { %v3230_v13 = vsel %vm3229_vm4, %v3228_v45, %v3223_v5  ;;  %v3242_v34 = vrot.slane %v4722_v19, %v3241_v49 }
 0x17f   :  { %v4726_v40 = vpop.permute.xlu1 %3123 }
 0x181   :  { %v4724_v9 = vpop.permute.xlu0 %3129 }
 0x183   :  { %v4728_v15 = vpop.permute.xlu1 %3126 }
 0x186   :  { %v3151_v14 = vpop.permute.xlu0 %3150 }
 0x187   :  { %v3311_v20 = vrot.slane %v3151_v14, %v3201_v16  ;;  %v3294_v16 = vadd.s32 4294967184, %v4739_v36 }
 0x18d   :  { %v4730_v21 = vpop.permute.xlu1 %3132 }
 0x193   :  { %v3157_v4 = vpop.permute.xlu0 %3156 }
 0x194   :  { %v3320_v50 = vrot.slane %v3157_v4, %v3213_v24  ;;  %v3273_v4 = vadd.s32 4294967208, %v4739_v36 }
 0x196   :  { %v3276_v19 = vsub.s32 %v3273_v4, %v3917_v17 }
 0x198   :  { %v3154_v43 = vpop.permute.xlu1 %3153 }
 0x199   :  { %v3315_v41 = vrot.slane %v3154_v43, %v3206_v33  ;;  %v3235_v43 = vrot.slane %v4720_v18, %v3234_v59  ;;  %v3249_v33 = vrot.slane %v4726_v40, %v3248_v22 }
 0x19b   :  { %v3316_v30 = vsel %vm3208_vm1, %v3315_v41, %v3311_v20  ;;  %v3237_v54 = vsel %vm3236_vm5, %v3235_v43, %v3230_v13 }
 0x19c   :  { %v3321_v44 = vsel %vm3215_vm2, %v3320_v50, %v3316_v30  ;;  %v3244_v50 = vsel %vm3243_vm6, %v3242_v34, %v3237_v54 }
 0x19d   :  { %v3163_v23 = vpop.permute.xlu0 %3162 }
 0x19e   :  { %v3330_v63 = vrot.slane %v3163_v23, %v3227_v11  ;;  %v3255_v23 = vsub.s32 %v3252_v3, %v3917_v17  ;;  %v3290_v11 = vsub.s32 %v3287_v29, %v3917_v17 }
 0x1a0   :  { %v3256_v40 = vrot.slane %v4728_v15, %v3255_v23 }
 0x1a2   :  { %v3160_v31 = vpop.permute.xlu1 %3159 }
 0x1a3   :  { %v3325_v35 = vrot.slane %v3160_v31, %v3220_v42  ;;  %v3266_v31 = vadd.s32 4294967216, %v4739_v36  ;;  %v3301_v42 = vadd.s32 4294967176, %v4739_v36 }
 0x1a5   :  { %v3326_v46 = vsel %vm3222_vm3, %v3325_v35, %v3321_v44  ;;  %v3269_v20 = vsub.s32 %v3266_v31, %v3917_v17  ;;  %v3297_v35 = vsub.s32 %v3294_v16, %v3917_v17  ;;  %v3304_v56 = vsub.s32 %v3301_v42, %v3917_v17 }
 0x1a6   :  { %v3331_v10 = vsel %vm3229_vm4, %v3330_v63, %v3326_v46 }
 0x1a8   :  { %v4732_v25 = vpop.permute.xlu0 %3168 }
 0x1a9   :  { %v3340_v12 = vrot.slane %v4732_v25, %v3241_v49  ;;  %v3262_v25 = vsub.s32 %v3259_v7, %v3917_v17 }
 0x1ab   :  { %v3263_v15 = vrot.slane %v4724_v9, %v3262_v25 }
 0x1ad   :  { %v3166_v26 = vpop.permute.xlu1 %3165 }
 0x1ae   :  { %v3335_v38 = vrot.slane %v3166_v26, %v3234_v59  ;;  %v3280_v26 = vadd.s32 4294967200, %v4739_v36  ;;  %v3270_v59 = vrot.slane %v4730_v21, %v3269_v20 }
 0x1b0   :  { %v3336_v8 = vsel %vm3236_vm5, %v3335_v38, %v3331_v10 }
 0x1b2   :  { %v4734_v27 = vpop.permute.xlu0 %3174 }
 0x1b3   :  { %v3350_v2 = vrot.slane %v4734_v27, %v3255_v23  ;;  %v3283_v27 = vsub.s32 %v3280_v26, %v3917_v17 }
 0x1b7   :  { %v4736_v28 = vpop.permute.xlu1 %3171 }
 0x1b8   :  { %v3345_v14 = vrot.slane %v4736_v28, %v3248_v22  ;;  %v3341_v28 = vsel %vm3243_vm6, %v3340_v12, %v3336_v8 }
 0x1ba   :  { %v3346_v61 = vsel %vm3250_vm7, %v3345_v14, %v3341_v28 }
 0x1bb   :  { %v3351_v30 = vsel %vm3257_vm8, %v3350_v2, %v3346_v61 }
 0x1bd   :  { %v4741_v0 = vpop.permute.xlu0 %3180 }
 0x1be   :  { %v3360_v36 = vrot.slane %v4741_v0, %v3269_v20 }
 0x1c2   :  { %v4745_v32 = vpop.permute.xlu1 %3177 }
 0x1c3   :  { %v3355_v41 = vrot.slane %v4745_v32, %v3262_v25  ;;  %v3251_v32 = vsel %vm3250_vm7, %v3249_v33, %v3244_v50 }
 0x1c4   :  { %v3258_v37 = vsel %vm3257_vm8, %v3256_v40, %v3251_v32 }
 0x1c5   :  { %v3356_v58 = vsel %vm3264_vm9, %v3355_v41, %v3351_v30  ;;  %v3265_v45 = vsel %vm3264_vm9, %v3263_v15, %v3258_v37 }
 0x1c6   :  { %v3361_v63 = vsel %vm3271_vm10, %v3360_v36, %v3356_v58  ;;  %v3272_v38 = vsel %vm3271_vm10, %v3270_v59, %v3265_v45 }
 0x1c7   :  { %v4749_v39 = vpop.permute.xlu0 %3183 }
 0x1c8   :  { %v3365_v53 = vrot.slane %v4749_v39, %v3276_v19 }
 0x1ca   :  { %v3366_v21 = vsel %vm3278_vm11, %v3365_v53, %v3361_v63 }
 0x1cc   :  { %v4757_v47 = vpop.permute.xlu1 %3135 }
 0x1cd   :  { %v3277_v0 = vrot.slane %v4757_v47, %v3276_v19 }
 0x1cf   :  { %v3279_v49 = vsel %vm3278_vm11, %v3277_v0, %v3272_v38 }
 0x1d2   :  { %v4761_v57 = vpop.permute.xlu0 %3186 }
 0x1d3   :  { %v3370_v60 = vrot.slane %v4761_v57, %v3283_v27 }
 0x1d5   :  { %v3371_v47 = vsel %vm3285_vm12, %v3370_v60, %v3366_v21 }
 0x1d7   :  { %v4774_v51 = vpop.permute.xlu1 %3138 }
 0x1d8   :  { %v3284_v39 = vrot.slane %v4774_v51, %v3283_v27 }
 0x1da   :  { %v3286_v51 = vsel %vm3285_vm12, %v3284_v39, %v3279_v49 }
 0x1dc   :  { %v4779_v55 = vpop.permute.xlu0 %3189 }
 0x1dd   :  { %v3375_v9 = vrot.slane %v4779_v55, %v3290_v11 }
 0x1df   :  { %v3376_v3 = vsel %vm3292_vm13, %v3375_v9, %v3371_v47 }
 0x1e1   :  { %v3142_v18 = vpop.permute.xlu1 %3141 }
 0x1e2   :  { %v3291_v46 = vrot.slane %v3142_v18, %v3290_v11 }
 0x1e4   :  { %v3293_v7 = vsel %vm3292_vm13, %v3291_v46, %v3286_v51 }
 0x1e7   :  { %v3193_v24 = vpop.permute.xlu0 %3192 }
 0x1e8   :  { %v3380_v17 = vrot.slane %v3193_v24, %v3297_v35 }
 0x1ea   :  { %v3381_v48 = vsel %vm3299_vm14, %v3380_v17, %v3376_v3 }
 0x1ec   :  { %v3145_v62 = vpop.permute.xlu1 %3144 }
 0x1ed   :  { %v3298_v1 = vrot.slane %v3145_v62, %v3297_v35 }
 0x1ef   :  { %v3300_v10 = vsel %vm3299_vm14, %v3298_v1, %v3293_v7 }
 0x1f1   :  { %v3196_v44 = vpop.permute.xlu0 %3195 }
 0x1f2   :  { %v3385_v57 = vrot.slane %v3196_v44, %v3304_v56 }
 0x1f4   :  { %v3386_v5 = vsel %vm3306_vm15, %v3385_v57, %v3381_v48 }
 0x1f6   :  { %v3148_v22 = vpop.permute.xlu1 %3147 }
 0x1f7   :  { %v3305_v55 = vrot.slane %v3148_v22, %v3304_v56 }
 0x1f9   :  { %v3307_v12 = vsel %vm3306_vm15, %v3305_v55, %v3300_v10 }
 0x1fa   :  { %v3387_v13 = vcombine.low %v3307_v12, %v3386_v5 }
 0x1fc   :  { %v3394_v8 = vrot.slane %v3387_v13, %v3949_v52 }
 0x1fe   :  { %v3401_v14 = vrot.slane %v3394_v8, %v3949_v52 }
 0x200   :  { %3407 = vst.msk [vmem:[#allocation3] sm:$0x3] %vm3405_vm0, %v3401_v14 }
 0x201   :  { %3599 = shalt.err (!%p3596_p4)
}
 0x202   :  { %3417 = dma.vmem_to_hbm [thread:$0]  %s3415_s10, 32, %s4844_s4, [#allocation4]  }
 0x203   :  { %3608 = dma.done.wait [#allocation4], 32  }
 0x204   :  { %3609 = vsyncadd [#allocation4], 4294967264 }
 0x205   :  { %3421 = vsyncpa [#allocation4], 1 }

</bundles_post_ra>
